<compile_context>
chip_gen: v7x
topology: tpu7x:2x2x1
jax: 0.10.0
libtpu: 0.0.40
codegen_flags: <defaults>
</compile_context>

<pallas_src>
import functools

import jax
import jax.numpy as jnp
from jax.experimental import pallas as pl
from jax.experimental.pallas import tpu as pltpu


_COMPILER_PARAMS = pltpu.CompilerParams(
    dimension_semantics=("parallel",),
    vmem_limit_bytes=48 * 1024 * 1024,
)


# --------------------------------------------------------------------------
# im2col helpers (operate on VALUES, never on refs, so no strided-ref reads)
# --------------------------------------------------------------------------
def _tap(pad_img, dy, dx, stride, ho, wo, c):
    """One 3x3 tap of a padded image, subsampled at `stride`, as (ho*wo, c)."""
    s = stride
    win = pad_img[dy:dy + s * ho, dx:dx + s * wo, :]        # (s*ho, s*wo, c)
    if s != 1:
        win = win.reshape(ho, s, s * wo, c)[:, 0]           # row phase 0
        win = win.reshape(ho, wo, s, c)[:, :, 0]            # col phase 0
    return win.reshape(ho * wo, c)


def _im2col(pad_img, stride, ho, wo, c):
    """9-tap im2col slab of one padded image: (ho*wo, 9*c), tap-major/channel-minor."""
    return jnp.concatenate(
        [_tap(pad_img, dy, dx, stride, ho, wo, c)
         for dy in range(3) for dx in range(3)], axis=1)


def _pick_group(n, hw_out):
    """Fold batch into matmul M for small spatial stages; keep >=2 grid steps
    (v7x megacore) when the batch allows it."""
    if hw_out >= 64 or n <= 1:
        return 1
    if n >= 4 and n % 2 == 0:
        return n // 2
    return n


# --------------------------------------------------------------------------
# Stem: conv3x3 (s=1, p=1) + folded BN + ReLU, fully fused (one im2col matmul)
# --------------------------------------------------------------------------
def _make_stem_kernel(h, w, cin, cout):
    hw = h * w

    def kernel(x_ref, w_ref, s_ref, b_ref, o_ref, pad_ref):
        @pl.when(pl.program_id(0) == 0)
        def _():
            pad_ref[...] = jnp.zeros_like(pad_ref)          # zero borders once

        pad_ref[1:h + 1, 1:w + 1, :] = (
            x_ref[...].reshape(h, w, cin).astype(jnp.bfloat16))
        pad = pad_ref[...]                                  # (h+2, w+2, cin) bf16
        col = _im2col(pad, 1, h, w, cin)                    # (hw, 9*cin) bf16
        acc = jnp.dot(col, w_ref[...], preferred_element_type=jnp.float32)
        y = jnp.maximum(acc * s_ref[...] + b_ref[...], 0.0)
        o_ref[...] = y.reshape(1, h, w, cout).astype(jnp.bfloat16)

    return kernel


@functools.lru_cache(maxsize=None)
def _stem_call(n, h, w, cin, cout):
    return pl.pallas_call(
        _make_stem_kernel(h, w, cin, cout),
        out_shape=jax.ShapeDtypeStruct((n, h, w, cout), jnp.bfloat16),
        grid=(n,),
        in_specs=[
            pl.BlockSpec((1, h, w, cin), lambda b: (b, 0, 0, 0)),
            pl.BlockSpec((9 * cin, cout), lambda b: (0, 0)),
            pl.BlockSpec((1, cout), lambda b: (0, 0)),
            pl.BlockSpec((1, cout), lambda b: (0, 0)),
        ],
        out_specs=pl.BlockSpec((1, h, w, cout), lambda b: (b, 0, 0, 0)),
        scratch_shapes=[pltpu.VMEM((h + 2, w + 2, cin), jnp.bfloat16)],
        compiler_params=_COMPILER_PARAMS,
    )


def stem(x, w, scale, shift):
    n, h, wd, cin = x.shape
    return _stem_call(n, h, wd, cin, w.shape[1])(x, w, scale, shift)


# --------------------------------------------------------------------------
# Fused SE pre-activation block:
#   BN1+ReLU -> conv3x3(s) -> BN2+ReLU -> conv3x3 -> SE -> + shortcut
# Each grid step processes G images (batch folded into the matmul M dim).
# --------------------------------------------------------------------------
def _make_block_kernel(g, h, w, cin, cout, stride, has_sc):
    ho, wo = h // stride, w // stride
    hw_out = ho * wo
    inv_hw = 1.0 / float(hw_out)

    def kernel(x_ref, s1_ref, b1_ref, w1_ref, s2_ref, b2_ref, w2_ref, *rest):
        if has_sc:
            (wsc_ref, sw1_ref, sb1_ref, sw2_ref, sb2_ref,
             o_ref, pad1_ref, pad2_ref) = rest
        else:
            (sw1_ref, sb1_ref, sw2_ref, sb2_ref,
             o_ref, pad1_ref, pad2_ref) = rest

        @pl.when(pl.program_id(0) == 0)
        def _():
            pad1_ref[...] = jnp.zeros_like(pad1_ref)        # zero borders once
            pad2_ref[...] = jnp.zeros_like(pad2_ref)

        # ---- BN1 + ReLU (folded), padded pre-activation in bf16 scratch ----
        x = x_ref[...]                                      # (g, h, w, cin) bf16
        pre = jnp.maximum(x.astype(jnp.float32) * s1_ref[...] + b1_ref[...], 0.0)
        pad1_ref[:, 1:h + 1, 1:w + 1, :] = pre.astype(jnp.bfloat16)
        pad1 = pad1_ref[...]                                # (g, h+2, w+2, cin)

        # ---- conv1 at the real stride: ONE im2col matmul (M = g*ho*wo) ----
        col1 = jnp.concatenate(
            [_im2col(pad1[i], stride, ho, wo, cin) for i in range(g)], axis=0)
        acc1 = jnp.dot(col1, w1_ref[...], preferred_element_type=jnp.float32)
        mid = jnp.maximum(acc1 * s2_ref[...] + b2_ref[...], 0.0)   # BN2 + ReLU
        pad2_ref[:, 1:ho + 1, 1:wo + 1, :] = (
            mid.astype(jnp.bfloat16).reshape(g, ho, wo, cout))
        pad2 = pad2_ref[...]                                # (g, ho+2, wo+2, cout)

        # ---- conv2 (stride 1): ONE im2col matmul ----
        col2 = jnp.concatenate(
            [_im2col(pad2[i], 1, ho, wo, cout) for i in range(g)], axis=0)
        acc2 = jnp.dot(col2, w2_ref[...], preferred_element_type=jnp.float32)
        acc2 = acc2.reshape(g, hw_out, cout)

        # ---- SE: per-image GAP -> FC -> ReLU -> FC -> sigmoid -> scale ----
        z = jnp.sum(acc2, axis=1) * inv_hw                  # (g, cout)
        hgate = jnp.maximum(
            jnp.dot(z, sw1_ref[...], preferred_element_type=jnp.float32)
            + sb1_ref[...], 0.0)
        gate = jax.nn.sigmoid(
            jnp.dot(hgate, sw2_ref[...], preferred_element_type=jnp.float32)
            + sb2_ref[...])
        outv = acc2 * gate[:, None, :]                      # (g, hw_out, cout)

        # ---- residual add ----
        if not has_sc:
            sc = x.reshape(g, hw_out, cin).astype(jnp.float32)
        else:
            # 1x1 projection of the pre-activated tensor at (stride*i, stride*j):
            # single strided-tap gather + one matmul (M = g*ho*wo).
            sc_in = jnp.concatenate(
                [_tap(pad1[i], 1, 1, stride, ho, wo, cin) for i in range(g)], axis=0)
            sc = jnp.dot(sc_in, wsc_ref[...],
                         preferred_element_type=jnp.float32).reshape(g, hw_out, cout)

        o_ref[...] = (outv + sc).reshape(g, ho, wo, cout).astype(jnp.bfloat16)

    return kernel


@functools.lru_cache(maxsize=None)
def _block_call(n, g, h, w, cin, cout, stride, has_sc, cr):
    ho, wo = h // stride, w // stride
    in_specs = [
        pl.BlockSpec((g, h, w, cin), lambda b: (b, 0, 0, 0)),   # x (bf16)
        pl.BlockSpec((1, cin), lambda b: (0, 0)),               # bn1 scale
        pl.BlockSpec((1, cin), lambda b: (0, 0)),               # bn1 shift
        pl.BlockSpec((9 * cin, cout), lambda b: (0, 0)),        # w1 (bf16, im2col)
        pl.BlockSpec((1, cout), lambda b: (0, 0)),              # bn2 scale
        pl.BlockSpec((1, cout), lambda b: (0, 0)),              # bn2 shift
        pl.BlockSpec((9 * cout, cout), lambda b: (0, 0)),       # w2 (bf16, im2col)
    ]
    if has_sc:
        in_specs.append(pl.BlockSpec((cin, cout), lambda b: (0, 0)))  # wsc (bf16)
    in_specs += [
        pl.BlockSpec((cout, cr), lambda b: (0, 0)),             # se fc1 w
        pl.BlockSpec((1, cr), lambda b: (0, 0)),                # se fc1 b
        pl.BlockSpec((cr, cout), lambda b: (0, 0)),             # se fc2 w
        pl.BlockSpec((1, cout), lambda b: (0, 0)),              # se fc2 b
    ]
    return pl.pallas_call(
        _make_block_kernel(g, h, w, cin, cout, stride, has_sc),
        out_shape=jax.ShapeDtypeStruct((n, ho, wo, cout), jnp.bfloat16),
        grid=(n // g,),
        in_specs=in_specs,
        out_specs=pl.BlockSpec((g, ho, wo, cout), lambda b: (b, 0, 0, 0)),
        scratch_shapes=[
            pltpu.VMEM((g, h + 2, w + 2, cin), jnp.bfloat16),   # padded conv1 input
            pltpu.VMEM((g, ho + 2, wo + 2, cout), jnp.bfloat16),  # padded conv2 input
        ],
        compiler_params=_COMPILER_PARAMS,
    )


def se_preact_block(x, p):
    n, h, w, cin = x.shape
    cout = p["w1"].shape[1]
    s = p["stride"]
    g = _pick_group(n, (h // s) * (w // s))
    has_sc = "wsc" in p
    cr = p["se"]["w1"].shape[1]
    args = [x, p["bn1"][0], p["bn1"][1], p["w1"],
            p["bn2"][0], p["bn2"][1], p["w2"]]
    if has_sc:
        args.append(p["wsc"])
    args += [p["se"]["w1"], p["se"]["b1"], p["se"]["w2"], p["se"]["b2"]]
    return _block_call(n, g, h, w, cin, cout, s, has_sc, cr)(*args)


# --------------------------------------------------------------------------
# Head: global average pool + fully-connected classifier
# --------------------------------------------------------------------------
def _make_head_kernel(hw):
    inv = 1.0 / float(hw)

    def kernel(x_ref, w_ref, b_ref, o_ref):
        z = jnp.sum(x_ref[...].astype(jnp.float32), axis=1) * inv     # (N, C)
        o_ref[...] = (jnp.dot(z, w_ref[...], preferred_element_type=jnp.float32)
                      + b_ref[...])

    return kernel


@functools.lru_cache(maxsize=None)
def _head_call(n, hw, c, nc):
    return pl.pallas_call(
        _make_head_kernel(hw),
        out_shape=jax.ShapeDtypeStruct((n, nc), jnp.float32),
        grid=(1,),
        in_specs=[
            pl.BlockSpec((n, hw, c), lambda i: (0, 0, 0)),
            pl.BlockSpec((c, nc), lambda i: (0, 0)),
            pl.BlockSpec((1, nc), lambda i: (0, 0)),
        ],
        out_specs=pl.BlockSpec((n, nc), lambda i: (0, 0)),
        compiler_params=_COMPILER_PARAMS,
    )


def gap_fc(x, w, b):
    n, h, wd, c = x.shape
    return _head_call(n, h * wd, c, w.shape[1])(x.reshape(n, h * wd, c), w, b)


# --------------------------------------------------------------------------
# Deterministic parameter initialization (shapes follow the PyTorch module)
# --------------------------------------------------------------------------
class KeyGen:
    def __init__(self, seed=0):
        self.key = jax.random.PRNGKey(seed)

    def __call__(self):
        self.key, sub = jax.random.split(self.key)
        return sub


def init_conv3x3(kg, cin, cout):
    fan_in = 9 * cin
    w = jax.random.normal(kg(), (3, 3, cin, cout), jnp.float32) * jnp.sqrt(2.0 / fan_in)
    return w.reshape(9 * cin, cout).astype(jnp.bfloat16)   # im2col layout: (tap*cin, cout)


def init_conv1x1(kg, cin, cout):
    w = jax.random.normal(kg(), (cin, cout), jnp.float32) * jnp.sqrt(2.0 / cin)
    return w.astype(jnp.bfloat16)


def init_bn(kg, c, eps=1e-5):
    gamma = 1.0 + 0.1 * jax.random.normal(kg(), (c,), jnp.float32)
    beta = 0.1 * jax.random.normal(kg(), (c,), jnp.float32)
    mean = 0.1 * jax.random.normal(kg(), (c,), jnp.float32)
    var = 1.0 + 0.1 * jnp.abs(jax.random.normal(kg(), (c,), jnp.float32))
    scale = gamma / jnp.sqrt(var + eps)
    shift = beta - mean * scale
    return scale.reshape(1, c), shift.reshape(1, c)


def init_linear(kg, cin, cout):
    w = jax.random.normal(kg(), (cin, cout), jnp.float32) * jnp.sqrt(1.0 / cin)
    b = 0.01 * jax.random.normal(kg(), (1, cout), jnp.float32)
    return w, b


def init_se(kg, c, r):
    cr = max(c // r, 1)
    w1, b1 = init_linear(kg, c, cr)
    w2, b2 = init_linear(kg, cr, c)
    return {"w1": w1, "b1": b1, "w2": w2, "b2": b2}


def init_block(kg, cin, cout, s, r):
    p = {"stride": s,
         "bn1": init_bn(kg, cin),
         "w1": init_conv3x3(kg, cin, cout),
         "bn2": init_bn(kg, cout),
         "w2": init_conv3x3(kg, cout, cout),
         "se": init_se(kg, cout, r)}
    if s != 1 or cin != cout:
        p["wsc"] = init_conv1x1(kg, cin, cout)
    return p


def init_model(kg, in_c, num_classes, r=16):
    params = {"stem_w": init_conv3x3(kg, in_c, 64),
              "stem_bn": init_bn(kg, 64)}
    blocks = []
    # ResNet-34 layout: (3, 4, 6, 3) SE pre-activation blocks.
    for cin, cout, s, nblk in [(64, 64, 1, 3), (64, 128, 2, 4),
                               (128, 256, 2, 6), (256, 512, 2, 3)]:
        for i in range(nblk):
            blocks.append(init_block(kg, cin if i == 0 else cout, cout,
                                     s if i == 0 else 1, r))
    params["blocks"] = blocks
    params["fc_w"], params["fc_b"] = init_linear(kg, 512, num_classes)
    return params


# --------------------------------------------------------------------------
# Forward pass
# --------------------------------------------------------------------------
def sepreact34_forward(params, x_nchw):
    x = jnp.transpose(x_nchw, (0, 2, 3, 1)).astype(jnp.float32)   # NCHW -> NHWC
    out = stem(x, params["stem_w"], *params["stem_bn"])           # ConvBlock (blc1)
    for p in params["blocks"]:                                    # blc2..blc5
        out = se_preact_block(out, p)
    return gap_fc(out, params["fc_w"], params["fc_b"])            # GAP + Linear


if __name__ == "__main__":
    IN_C, NUM_CLASSES, R = 4, 10, 16
    N, H, W = 2, 16, 16

    kg = KeyGen(0)
    params = init_model(kg, IN_C, NUM_CLASSES, r=R)
    x = jax.random.normal(jax.random.PRNGKey(0), (N, IN_C, H, W), jnp.float32)

    logits = sepreact34_forward(params, x)
    logits = jax.block_until_ready(logits)

    assert logits.shape == (N, NUM_CLASSES), logits.shape
    assert bool(jnp.all(jnp.isfinite(logits)))
    print("KERNEL_OK")
</pallas_src>

<mosaic_0001>
module attributes {stable_mosaic.version = 11 : i64} {
  func.func @kernel(%arg0: i32, %arg1: memref<1x16x16x4xf32, #tpu.memory_space<vmem>>, %arg2: memref<36x64xbf16, #tpu.memory_space<vmem>>, %arg3: memref<1x64xf32, #tpu.memory_space<vmem>>, %arg4: memref<1x64xf32, #tpu.memory_space<vmem>>, %arg5: memref<1x16x16x64xbf16, #tpu.memory_space<vmem>>, %arg6: memref<18x18x4xbf16, #tpu.memory_space<vmem>>) attributes {dimension_semantics = [#tpu.dimension_semantics<parallel>], iteration_bounds = array<i64: 2>, scalar_prefetch = 0 : i64, scratch_operands = 1 : i64, tpu.core_type = #tpu.core_type<tc>, window_params = [{transform_indices = @transform_0, window_bounds = array<i64: 1, 16, 16, 4>}, {pipeline_mode = #tpu.pipeline_mode<synchronous>, transform_indices = @transform_1, window_bounds = array<i64: 36, 64>}, {pipeline_mode = #tpu.pipeline_mode<synchronous>, transform_indices = @transform_2, window_bounds = array<i64: 1, 64>}, {pipeline_mode = #tpu.pipeline_mode<synchronous>, transform_indices = @transform_3, window_bounds = array<i64: 1, 64>}, {transform_indices = @transform_4, window_bounds = array<i64: 1, 16, 16, 64>}]} {
    %c0_i32 = arith.constant 0 : i32
    %0 = arith.cmpi eq, %arg0, %c0_i32 : i32
    %1 = arith.extui %0 : i1 to i32
    %c0_i32_0 = arith.constant 0 : i32
    %2 = arith.cmpi ne, %1, %c0_i32_0 : i32
    scf.if %2 {
      %cst_20 = arith.constant 0.000000e+00 : bf16
      %40 = vector.broadcast %cst_20 : bf16 to vector<18x18x4xbf16>
      %c0_21 = arith.constant 0 : index
      %c0_22 = arith.constant 0 : index
      %c0_23 = arith.constant 0 : index
      %41 = vector.load %arg6[%c0_21, %c0_22, %c0_23] : memref<18x18x4xbf16, #tpu.memory_space<vmem>>, vector<18x18x4xbf16>
      tpu.vector_store %arg6[%c0_21, %c0_22, %c0_23], %40 {strides = array<i32>} : memref<18x18x4xbf16, #tpu.memory_space<vmem>>, vector<18x18x4xbf16>,
    } else {
    }
    %c0 = arith.constant 0 : index
    %c0_1 = arith.constant 0 : index
    %c0_2 = arith.constant 0 : index
    %c0_3 = arith.constant 0 : index
    %3 = vector.load %arg1[%c0, %c0_1, %c0_2, %c0_3] : memref<1x16x16x4xf32, #tpu.memory_space<vmem>>, vector<1x16x16x4xf32>
    %4 = vector.shape_cast %3 : vector<1x16x16x4xf32> to vector<16x16x4xf32>
    %5 = arith.truncf %4 : vector<16x16x4xf32> to vector<16x16x4xbf16>
    %c1 = arith.constant 1 : index
    %c1_4 = arith.constant 1 : index
    %c0_5 = arith.constant 0 : index
    %6 = vector.load %arg6[%c1, %c1_4, %c0_5] : memref<18x18x4xbf16, #tpu.memory_space<vmem>>, vector<16x16x4xbf16>
    tpu.vector_store %arg6[%c1, %c1_4, %c0_5], %5 {strides = array<i32>} : memref<18x18x4xbf16, #tpu.memory_space<vmem>>, vector<16x16x4xbf16>,
    %c0_6 = arith.constant 0 : index
    %c0_7 = arith.constant 0 : index
    %c0_8 = arith.constant 0 : index
    %7 = vector.load %arg6[%c0_6, %c0_7, %c0_8] : memref<18x18x4xbf16, #tpu.memory_space<vmem>>, vector<18x18x4xbf16>
    %8 = vector.extract_strided_slice %7 {offsets = [0, 0, 0], sizes = [16, 16, 4], strides = [1, 1, 1]} : vector<18x18x4xbf16> to vector<16x16x4xbf16>
    %9 = vector.shape_cast %8 : vector<16x16x4xbf16> to vector<256x4xbf16>
    %10 = vector.extract_strided_slice %7 {offsets = [0, 1, 0], sizes = [16, 16, 4], strides = [1, 1, 1]} : vector<18x18x4xbf16> to vector<16x16x4xbf16>
    %11 = vector.shape_cast %10 : vector<16x16x4xbf16> to vector<256x4xbf16>
    %12 = vector.extract_strided_slice %7 {offsets = [0, 2, 0], sizes = [16, 16, 4], strides = [1, 1, 1]} : vector<18x18x4xbf16> to vector<16x16x4xbf16>
    %13 = vector.shape_cast %12 : vector<16x16x4xbf16> to vector<256x4xbf16>
    %14 = vector.extract_strided_slice %7 {offsets = [1, 0, 0], sizes = [16, 16, 4], strides = [1, 1, 1]} : vector<18x18x4xbf16> to vector<16x16x4xbf16>
    %15 = vector.shape_cast %14 : vector<16x16x4xbf16> to vector<256x4xbf16>
    %16 = vector.extract_strided_slice %7 {offsets = [1, 1, 0], sizes = [16, 16, 4], strides = [1, 1, 1]} : vector<18x18x4xbf16> to vector<16x16x4xbf16>
    %17 = vector.shape_cast %16 : vector<16x16x4xbf16> to vector<256x4xbf16>
    %18 = vector.extract_strided_slice %7 {offsets = [1, 2, 0], sizes = [16, 16, 4], strides = [1, 1, 1]} : vector<18x18x4xbf16> to vector<16x16x4xbf16>
    %19 = vector.shape_cast %18 : vector<16x16x4xbf16> to vector<256x4xbf16>
    %20 = vector.extract_strided_slice %7 {offsets = [2, 0, 0], sizes = [16, 16, 4], strides = [1, 1, 1]} : vector<18x18x4xbf16> to vector<16x16x4xbf16>
    %21 = vector.shape_cast %20 : vector<16x16x4xbf16> to vector<256x4xbf16>
    %22 = vector.extract_strided_slice %7 {offsets = [2, 1, 0], sizes = [16, 16, 4], strides = [1, 1, 1]} : vector<18x18x4xbf16> to vector<16x16x4xbf16>
    %23 = vector.shape_cast %22 : vector<16x16x4xbf16> to vector<256x4xbf16>
    %24 = vector.extract_strided_slice %7 {offsets = [2, 2, 0], sizes = [16, 16, 4], strides = [1, 1, 1]} : vector<18x18x4xbf16> to vector<16x16x4xbf16>
    %25 = vector.shape_cast %24 : vector<16x16x4xbf16> to vector<256x4xbf16>
    %26 = tpu.concatenate %9, %11, %13, %15, %17, %19, %21, %23, %25 in 1 : vector<256x4xbf16>, vector<256x4xbf16>, vector<256x4xbf16>, vector<256x4xbf16>, vector<256x4xbf16>, vector<256x4xbf16>, vector<256x4xbf16>, vector<256x4xbf16>, vector<256x4xbf16> -> vector<256x36xbf16>
    %c0_9 = arith.constant 0 : index
    %c0_10 = arith.constant 0 : index
    %27 = vector.load %arg2[%c0_9, %c0_10] : memref<36x64xbf16, #tpu.memory_space<vmem>>, vector<36x64xbf16>
    %cst = arith.constant dense<0.000000e+00> : vector<256x64xf32>
    %28 = tpu.matmul %26, %27, %cst {dimension_numbers = #tpu.dot_dimension_numbers<[1], [0], [0], [1], [0, 0, 1, 1], [], []>} : vector<256x36xbf16>, vector<36x64xbf16>, vector<256x64xf32> -> vector<256x64xf32>
    %c0_11 = arith.constant 0 : index
    %c0_12 = arith.constant 0 : index
    %29 = vector.load %arg3[%c0_11, %c0_12] : memref<1x64xf32, #tpu.memory_space<vmem>>, vector<1x64xf32>
    %30 = vector.broadcast %29 : vector<1x64xf32> to vector<256x64xf32>
    %31 = arith.mulf %28, %30 : vector<256x64xf32>
    %c0_13 = arith.constant 0 : index
    %c0_14 = arith.constant 0 : index
    %32 = vector.load %arg4[%c0_13, %c0_14] : memref<1x64xf32, #tpu.memory_space<vmem>>, vector<1x64xf32>
    %33 = vector.broadcast %32 : vector<1x64xf32> to vector<256x64xf32>
    %34 = arith.addf %31, %33 : vector<256x64xf32>
    %cst_15 = arith.constant 0.000000e+00 : f32
    %35 = vector.broadcast %cst_15 : f32 to vector<256x64xf32>
    %36 = arith.maximumf %34, %35 : vector<256x64xf32>
    %37 = vector.shape_cast %36 : vector<256x64xf32> to vector<1x16x16x64xf32>
    %38 = arith.truncf %37 : vector<1x16x16x64xf32> to vector<1x16x16x64xbf16>
    %c0_16 = arith.constant 0 : index
    %c0_17 = arith.constant 0 : index
    %c0_18 = arith.constant 0 : index
    %c0_19 = arith.constant 0 : index
    %39 = vector.load %arg5[%c0_16, %c0_17, %c0_18, %c0_19] : memref<1x16x16x64xbf16, #tpu.memory_space<vmem>>, vector<1x16x16x64xbf16>
    tpu.vector_store %arg5[%c0_16, %c0_17, %c0_18, %c0_19], %38 {strides = array<i32>} : memref<1x16x16x64xbf16, #tpu.memory_space<vmem>>, vector<1x16x16x64xbf16>,
    return
  }
  func.func @transform_0(%arg0: i32) -> (i32, i32, i32, i32) {
    %c0_i32 = arith.constant 0 : i32
    %c0_i32_0 = arith.constant 0 : i32
    %c0_i32_1 = arith.constant 0 : i32
    %c0_i32_2 = arith.constant 0 : i32
    return %arg0, %c0_i32, %c0_i32_0, %c0_i32_1 : i32, i32, i32, i32
  }
  func.func @transform_1(%arg0: i32) -> (i32, i32) {
    %c0_i32 = arith.constant 0 : i32
    %c0_i32_0 = arith.constant 0 : i32
    %c0_i32_1 = arith.constant 0 : i32
    return %c0_i32, %c0_i32_0 : i32, i32
  }
  func.func @transform_2(%arg0: i32) -> (i32, i32) {
    %c0_i32 = arith.constant 0 : i32
    %c0_i32_0 = arith.constant 0 : i32
    %c0_i32_1 = arith.constant 0 : i32
    return %c0_i32, %c0_i32_0 : i32, i32
  }
  func.func @transform_3(%arg0: i32) -> (i32, i32) {
    %c0_i32 = arith.constant 0 : i32
    %c0_i32_0 = arith.constant 0 : i32
    %c0_i32_1 = arith.constant 0 : i32
    return %c0_i32, %c0_i32_0 : i32, i32
  }
  func.func @transform_4(%arg0: i32) -> (i32, i32, i32, i32) {
    %c0_i32 = arith.constant 0 : i32
    %c0_i32_0 = arith.constant 0 : i32
    %c0_i32_1 = arith.constant 0 : i32
    %c0_i32_2 = arith.constant 0 : i32
    return %arg0, %c0_i32, %c0_i32_0, %c0_i32_1 : i32, i32, i32, i32
  }
}

</mosaic_0001>

<bundles_post_ra>
// kernel: tpu_custom_call.1
= control target key start
LH: loop header
LB: loop body
LE: loop exit
PB: predicated region body
PF: predicated region fallthrough
CT: control target
= control target key end

     0   :  { %9 = vsyncpa [#allocation4], 0  ;;  %s4756_s0 = inlined_call_operand.vmem [shape: f32[2,16,16,4], index: 0, kind: input, shape index: {}]   ;;  %s4757_s1 = inlined_call_operand.vmem [shape: bf16[36,64], index: 1, kind: input, shape index: {}]   ;;  %s4758_s2 = inlined_call_operand.vmem [shape: f32[1,64], index: 2, kind: input, shape index: {}]   ;;  %s4759_s3 = inlined_call_operand.vmem [shape: f32[1,64], index: 3, kind: input, shape index: {}]   ;;  %s4760_s4 = inlined_call_operand.hbm [shape: bf16[2,16,16,64], index: 4, kind: output, shape index: {}]  }
   0x1   :  { %11 = vsyncpa [#allocation4 + $0x1], 0  ;;  %s3235_s15 = smov 0   ;;  %s3237_s16 = smov 0  }
   0x2   :  { %s3239_s17 = smov 0   ;;  %s3241_s18 = smov 0  }
   0x3 LB: > { %s3256_s19 = sadd.s32 4294967295, %s3197_s18   ;;  %s2762_s20 = sadd.s32 4294967294, %s3197_s18   ;;  %s3197_s18 = sphi %s3241_s18, %s4791_s18   ;;  %s3193_s17 = sphi %s3239_s17, %s4790_s17   ;;  %s3189_s16 = sphi %s3237_s16, %s4789_s16   ;;  %s3185_s15 = sphi %s3235_s15, %s4788_s15  }
   0x4   : > { %s3260_s21 = sadd.s32 1, %s3197_s18   ;;  %s113_s22 = sadd.s32 1, %s3193_s17 }
   0x5   : > { %s110_s23 = ssub.s32 %s3197_s18, %s3260_s21  ;;  %p123_p0 = scmp.ne.s32.totalorder %s3193_s17, %s3189_s16 }
   0x6   : > { %p111_p1 = scmp.eq.s32.totalorder %s110_s23, 0  ;;  %p124_p2 = scmp.eq.s32.totalorder %s3256_s19, 1 }
   0x7   : > { %p129_p3 = scmp.ne.s32.totalorder %s3189_s16, %s3185_s15  ;;  %p130_p4 = scmp.eq.s32.totalorder %s2762_s20, 1 }
   0x8   : > { %s3271_s24 = scalar_select %p111_p1, %s3193_s17, %s113_s22  }
   0x9   : > { %p3273_p5 = por %p124_p2, %p123_p0  ;;  %p3277_p6 = por %p130_p4, %p129_p3 }
   0xa   : > { %p2765_p7 = scmp.ge.s32.totalorder %s3197_s18, 1  ;;  %p165_p8 = scmp.lt.s32.totalorder %s3197_s18, 3 }
   0xc   : > { %p166_p9 = pnand %p2765_p7, %p165_p8 }
   0xe   : > { %169 = sbr.rel (%p166_p9) target bundleno = 700 (0x2bc), region = 36 }
  0x15   : > { %s188_s27 = sand.u32 1, %s3189_s16   ;;  %p191_p10 = scmp.lt.s32.totalorder %s3256_s19, 1 }
  0x16   : > { %s2766_s28 = sshll.u32 %s188_s27, 7  ;;  %p2769_p11 = scmp.ne.s32.totalorder %s3256_s19, 0 }
  0x17   : > { %s192_s29 = scalar_select %p191_p10, %s3256_s19, 1 }
  0x18   : > { %s3293_s8 = scalar_lea.vmem [#allocation3], %s2766_s28  ;;  %200 = sbr.rel (%p2769_p11) target bundleno = 52 (0x34), region = 40  ;;  %vm201_vm0 = vcmask (!%p2769_p11), 27648   ;;  %vm204_vm1 = vcmask (!%p2769_p11), 24576   ;;  %v3199_v0 = vmov (!%p2769_p11), 0  }
  0x19   : > { %s2932_s30 = sshll.u32 %s192_s29, 8  ;;  %202 = vst.msk [vmem:[#allocation2] sm:$0xf] (!%p2769_p11), %vm201_vm0, %v3199_v0  ;;  %203 = vst.msk [vmem:[#allocation2 + $0x4] sm:$0xf] (!%p2769_p11), %vm201_vm0, %v3199_v0 }
  0x1a   : > { %s3291_s7 = scalar_lea.vmem %s4756_s0, %s2932_s30  ;;  %206 = vst.msk [vmem:[#allocation2 + $0xc] sm:$0xf] (!%p2769_p11), %vm201_vm0, %v3199_v0  ;;  %207 = vst.msk [vmem:[#allocation2 + $0x10] sm:$0xf] (!%p2769_p11), %vm201_vm0, %v3199_v0 }
  0x1b   : > { %209 = vst.msk [vmem:[#allocation2 + $0x18] sm:$0xf] (!%p2769_p11), %vm201_vm0, %v3199_v0  ;;  %210 = vst.msk [vmem:[#allocation2 + $0x1c] sm:$0xf] (!%p2769_p11), %vm201_vm0, %v3199_v0 }
  0x1c   : > { %212 = vst.msk [vmem:[#allocation2 + $0x24] sm:$0xf] (!%p2769_p11), %vm201_vm0, %v3199_v0  ;;  %213 = vst.msk [vmem:[#allocation2 + $0x28] sm:$0xf] (!%p2769_p11), %vm201_vm0, %v3199_v0 }
  0x1d   : > { %215 = vst.msk [vmem:[#allocation2 + $0x30] sm:$0xf] (!%p2769_p11), %vm201_vm0, %v3199_v0  ;;  %216 = vst.msk [vmem:[#allocation2 + $0x34] sm:$0xf] (!%p2769_p11), %vm201_vm0, %v3199_v0 }
  0x1e   : > { %218 = vst.msk [vmem:[#allocation2 + $0x3c] sm:$0xf] (!%p2769_p11), %vm201_vm0, %v3199_v0  ;;  %219 = vst.msk [vmem:[#allocation2 + $0x40] sm:$0xf] (!%p2769_p11), %vm201_vm0, %v3199_v0 }
  0x1f   : > { %221 = vst.msk [vmem:[#allocation2 + $0x48] sm:$0xf] %vm201_vm0, %v3199_v0  ;;  %222 = vst.msk [vmem:[#allocation2 + $0x4c] sm:$0xf] %vm201_vm0, %v3199_v0 }
  0x20   : > { %224 = vst.msk [vmem:[#allocation2 + $0x54] sm:$0xf] %vm201_vm0, %v3199_v0  ;;  %225 = vst.msk [vmem:[#allocation2 + $0x58] sm:$0xf] %vm201_vm0, %v3199_v0 }
  0x21   : > { %227 = vst.msk [vmem:[#allocation2 + $0x60] sm:$0xf] %vm201_vm0, %v3199_v0  ;;  %228 = vst.msk [vmem:[#allocation2 + $0x64] sm:$0xf] %vm201_vm0, %v3199_v0 }
  0x22   : > { %230 = vst.msk [vmem:[#allocation2 + $0x6c] sm:$0xf] %vm201_vm0, %v3199_v0  ;;  %231 = vst.msk [vmem:[#allocation2 + $0x70] sm:$0xf] %vm201_vm0, %v3199_v0 }
  0x23   : > { %233 = vst.msk [vmem:[#allocation2 + $0x78] sm:$0xf] %vm201_vm0, %v3199_v0  ;;  %234 = vst.msk [vmem:[#allocation2 + $0x7c] sm:$0xf] %vm201_vm0, %v3199_v0 }
  0x24   : > { %236 = vst.msk [vmem:[#allocation2 + $0x84] sm:$0xf] %vm201_vm0, %v3199_v0  ;;  %237 = vst.msk [vmem:[#allocation2 + $0x88] sm:$0xf] %vm201_vm0, %v3199_v0 }
  0x25   : > { %239 = vst.msk [vmem:[#allocation2 + $0x90] sm:$0xf] %vm201_vm0, %v3199_v0  ;;  %240 = vst.msk [vmem:[#allocation2 + $0x94] sm:$0xf] %vm201_vm0, %v3199_v0 }
  0x26   : > { %242 = vst.msk [vmem:[#allocation2 + $0x9c] sm:$0xf] %vm201_vm0, %v3199_v0  ;;  %243 = vst.msk [vmem:[#allocation2 + $0xa0] sm:$0xf] %vm201_vm0, %v3199_v0 }
  0x27   : > { %245 = vst.msk [vmem:[#allocation2 + $0xa8] sm:$0xf] %vm201_vm0, %v3199_v0  ;;  %246 = vst.msk [vmem:[#allocation2 + $0xac] sm:$0xf] %vm201_vm0, %v3199_v0 }
  0x28   : > { %248 = vst.msk [vmem:[#allocation2 + $0xb4] sm:$0xf] %vm201_vm0, %v3199_v0  ;;  %249 = vst.msk [vmem:[#allocation2 + $0xb8] sm:$0xf] %vm201_vm0, %v3199_v0 }
  0x29   : > { %251 = vst.msk [vmem:[#allocation2 + $0xc0] sm:$0xf] %vm201_vm0, %v3199_v0  ;;  %252 = vst.msk [vmem:[#allocation2 + $0xc4] sm:$0xf] %vm201_vm0, %v3199_v0 }
  0x2a   : > { %254 = vst.msk [vmem:[#allocation2 + $0xcc] sm:$0xf] %vm201_vm0, %v3199_v0  ;;  %255 = vst.msk [vmem:[#allocation2 + $0xd0] sm:$0xf] %vm201_vm0, %v3199_v0 }
  0x2b   : > { %205 = vst.msk [vmem:[#allocation2 + $0x8] sm:$0x1] %vm204_vm1, %v3199_v0  ;;  %208 = vst.msk [vmem:[#allocation2 + $0x14] sm:$0x1] %vm204_vm1, %v3199_v0 }
  0x2c   : > { %211 = vst.msk [vmem:[#allocation2 + $0x20] sm:$0x1] %vm204_vm1, %v3199_v0  ;;  %214 = vst.msk [vmem:[#allocation2 + $0x2c] sm:$0x1] %vm204_vm1, %v3199_v0 }
  0x2d   : > { %217 = vst.msk [vmem:[#allocation2 + $0x38] sm:$0x1] %vm204_vm1, %v3199_v0  ;;  %220 = vst.msk [vmem:[#allocation2 + $0x44] sm:$0x1] %vm204_vm1, %v3199_v0 }
  0x2e   : > { %223 = vst.msk [vmem:[#allocation2 + $0x50] sm:$0x1] %vm204_vm1, %v3199_v0  ;;  %226 = vst.msk [vmem:[#allocation2 + $0x5c] sm:$0x1] %vm204_vm1, %v3199_v0 }
  0x2f   : > { %229 = vst.msk [vmem:[#allocation2 + $0x68] sm:$0x1] %vm204_vm1, %v3199_v0  ;;  %232 = vst.msk [vmem:[#allocation2 + $0x74] sm:$0x1] %vm204_vm1, %v3199_v0 }
  0x30   : > { %235 = vst.msk [vmem:[#allocation2 + $0x80] sm:$0x1] %vm204_vm1, %v3199_v0  ;;  %238 = vst.msk [vmem:[#allocation2 + $0x8c] sm:$0x1] %vm204_vm1, %v3199_v0 }
  0x31   : > { %241 = vst.msk [vmem:[#allocation2 + $0x98] sm:$0x1] %vm204_vm1, %v3199_v0  ;;  %244 = vst.msk [vmem:[#allocation2 + $0xa4] sm:$0x1] %vm204_vm1, %v3199_v0 }
  0x32   : > { %247 = vst.msk [vmem:[#allocation2 + $0xb0] sm:$0x1] %vm204_vm1, %v3199_v0  ;;  %250 = vst.msk [vmem:[#allocation2 + $0xbc] sm:$0x1] %vm204_vm1, %v3199_v0 }
  0x33   : > { %253 = vst.msk [vmem:[#allocation2 + $0xc8] sm:$0x1] %vm204_vm1, %v3199_v0  ;;  %256 = vst.msk [vmem:[#allocation2 + $0xd4] sm:$0x1] %vm204_vm1, %v3199_v0 }
  0x34 PF: > { %v829_v3 = vld [vmem:[#allocation2 + $0x8] sm:$0x1]  ;;  %vm1316_vm2 = vcmask 1042432   ;;  %vm1317_vm3 = vcmask 1046532   ;;  %vm881_vm5 = vsmask.f32 3328 }
  0x35   : > { %v827_v1 = vld [vmem:[#allocation2] sm:$0xf]  ;;  %v828_v2 = vld [vmem:[#allocation2 + $0x4] sm:$0xf]  ;;  %v904_v4 = vshll.u32 %v829_v3, 16  ;;  %vm3350_vm4 = vmor %vm1316_vm2, %vm1317_vm3  ;;  %v1324_v8 = vrot.slane %v829_v3, 5 }
  0x36   : > { %v2802_v5 = vrot.slane %v827_v1, 9  ;;  %v1321_v7 = vrot.slane %v828_v2, 5  ;;  %vm882_vm6 = vsmask.f32 7440  ;;  %v885_v9 = vshrl.u32 %v827_v1, 16  ;;  %v273_v13 = vld [vmem:[%s3291_s7 + $0x80] sm:$0xff] }
  0x37   : > { %v888_v10 = vshll.u32 %v827_v1, 16  ;;  %v894_v11 = vshll.u32 %v828_v2, 16  ;;  %v898_v12 = vshrl.u32 %v828_v2, 16  ;;  %v274_v14 = vld [vmem:[%s3291_s7 + $0x88] sm:$0xff]  ;;  %v906_v17 = vrot.slane %v904_v4, 5  ;;  %v257_v29 = vld [vmem:[%s3291_s7] sm:$0xff]  ;;  %vm3364_vm9 = vmor %vm881_vm5, %vm882_vm6 }
  0x38   : > { %v1322_v15 = vsel %vm3350_vm4, %v2802_v5, %v1321_v7  ;;  %v1323_v16 = vrot.slane %v1321_v7, 4  ;;  %v2949_v18 = vpack.c.bf16 %v273_v13, %v273_v13  ;;  %v887_v19 = vrot.slane %v885_v9, 4  ;;  %v258_v30 = vld [vmem:[%s3291_s7 + $0x8] sm:$0xff]  ;;  %s3200_s9 = smov 8   ;;  %v275_v43 = vld [vmem:[%s3291_s7 + $0x90] sm:$0xff]  ;;  %v276_v49 = vld [vmem:[%s3291_s7 + $0x98] sm:$0xff] }
  0x39   : > { %v890_v20 = vrot.slane %v888_v10, 5  ;;  %v896_v21 = vrot.slane %v894_v11, 5  ;;  %v900_v22 = vrot.slane %v898_v12, 4  ;;  %v2950_v24 = vpack.c.bf16 %v274_v14, %v274_v14  ;;  %v771_v40 = vld [vmem:[#allocation2 + $0x6c] sm:$0xf]  ;;  %v259_v50 = vld [vmem:[%s3291_s7 + $0x10] sm:$0xff] }
  0x3a   : > { %v1325_v23 = vsel %vm3350_vm4, %v1323_v16, %v1324_v8  ;;  %vm385_vm7 = vsmask.f32 256  ;;  %vm386_vm8 = vsmask.f32 4368  ;;  %v525_v28 = vshrl.u32 %v2949_v18, 16  ;;  %v260_v55 = vld [vmem:[%s3291_s7 + $0x18] sm:$0xff] }
  0x3b   : > { %v2852_v25 = vcombine.low %v1322_v15, %v1325_v23  ;;  %v891_v26 = vor.u32 %v890_v20, %v887_v19  ;;  %v901_v27 = vor.u32 %v900_v22, %v896_v21  ;;  %v528_v32 = vshll.u32 %v2949_v18, 16  ;;  %vm3383_vm13 = vmor %vm385_vm7, %vm386_vm8  ;;  %s3201_s10 = smov 4   ;;  %v712_v1 = vld [vmem:[#allocation2 + $0xc] sm:$0xf]  ;;  %v271_v14 = vld [vmem:[%s3291_s7 + $0x70] sm:$0xff]  ;;  %s3202_s11 = smov 12  }
  0x3c   : > { %v533_v33 = vshrl.u32 %v2950_v24, 16  ;;  %v536_v34 = vshll.u32 %v2950_v24, 16  ;;  %vm709_vm10 = vcmask 27648   ;;  %v527_v37 = vrot.slane %v525_v28, 7  ;;  %v272_v15 = vld [vmem:[%s3291_s7 + $0x78] sm:$0xff]  ;;  %s3203_s12 = smov 16  }
  0x3d   : > { %1675 = vrot.lane.b32.xlu0 %v2852_v25, %s3200_s9  ;;  %v892_v35 = vrot.slane %v891_v26, 4  ;;  %v902_v36 = vrot.slane %v901_v27, 4  ;;  %vm710_vm11 = vsmask.f32 7938  ;;  %v2933_v41 = vpack.c.bf16 %v257_v29, %v257_v29  ;;  %v778_v18 = vld [vmem:[#allocation2 + $0x78] sm:$0xf] }
  0x3e   : > { %v3369_v38 = vrot.slane %v533_v33, 7  ;;  %vm3372_vm12 = vmand %vm709_vm10, %vm710_vm11  ;;  %v2934_v42 = vpack.c.bf16 %v258_v30, %v258_v30  ;;  %v530_v47 = vor.u32 %v528_v32, %v527_v37  ;;  %v531_v48 = vrot.slane %v527_v37, 4  ;;  %v722_v27 = vld [vmem:[#allocation2 + $0x18] sm:$0xf]  ;;  %s3204_s13 = smov 20   ;;  %s3205_s14 = smov 24  }
  0x3f   : > { %v897_v44 = vsel %vm3364_vm9, %v892_v35, %v896_v21  ;;  %v907_v45 = vsel %vm3364_vm9, %v902_v36, %v906_v17  ;;  %vm717_vm14 = vcmask 24576   ;;  %v389_v53 = vshrl.u32 %v2933_v41, 16  ;;  %s3206_s29 = smov 28   ;;  %s3207_s30 = smov 32  }
  0x40   : > { %v2836_v51 = vcombine.low %v897_v44, %v907_v45  ;;  %v538_v52 = vor.u32 %v536_v34, %v3369_v38  ;;  %v392_v54 = vshll.u32 %v2933_v41, 16  ;;  %v772_v56 = vsel %vm3372_vm12, %v530_v47, %v771_v40  ;;  %vm3415_vm15 = vmand %vm717_vm14, %vm385_vm7 }
  0x41   : > { %v397_v57 = vshrl.u32 %v2934_v42, 16  ;;  %v400_v58 = vshll.u32 %v2934_v42, 16  ;;  %v2951_v59 = vpack.c.bf16 %v275_v43, %v275_v43  ;;  %773 = vst [vmem:[#allocation2 + $0x6c] sm:$0xf] %v772_v56  ;;  %v391_v61 = vrot.slane %v389_v53, 7 }
  0x42   : > { %1595 = vrot.lane.b32.xlu0 %v2836_v51, %s3201_s10  ;;  %v539_v60 = vsel %vm3383_vm13, %v531_v48, %v538_v52  ;;  %v2952_v62 = vpack.c.bf16 %v276_v49, %v276_v49  ;;  %v2935_v63 = vpack.c.bf16 %v259_v50, %v259_v50  ;;  %v2936_v4 = vpack.c.bf16 %v260_v55, %v260_v55  ;;  %v719_v43 = vld [vmem:[#allocation2 + $0x14] sm:$0x1]  ;;  %v764_v53 = vld [vmem:[#allocation2 + $0x60] sm:$0xf]  ;;  %v768_v56 = vld [vmem:[#allocation2 + $0x68] sm:$0x1] }
  0x43   : > { %774 = vst.msk [vmem:[#allocation2 + $0x70] sm:$0xf] %vm709_vm10, %v539_v60  ;;  %v399_v0 = vrot.slane %v397_v57, 7  ;;  %v542_v2 = vshrl.u32 %v2951_v59, 16  ;;  %v545_v3 = vshll.u32 %v2951_v59, 16  ;;  %v394_v5 = vor.u32 %v392_v54, %v391_v61 }
  0x44   : > { %v395_v7 = vrot.slane %v391_v61, 4  ;;  %v550_v8 = vshrl.u32 %v2952_v62, 16  ;;  %v553_v9 = vshll.u32 %v2952_v62, 16  ;;  %v406_v12 = vshrl.u32 %v2935_v63, 16  ;;  %v775_v59 = vld [vmem:[#allocation2 + $0x74] sm:$0x1] }
  0x45   : > { %v402_v10 = vor.u32 %v400_v58, %v399_v0  ;;  %v544_v11 = vrot.slane %v542_v2, 7  ;;  %v409_v13 = vshll.u32 %v2935_v63, 16  ;;  %v713_v16 = vsel %vm3372_vm12, %v394_v5, %v712_v1 }
  0x46   : > { %v3401_v17 = vrot.slane %v550_v8, 7  ;;  %v414_v19 = vshrl.u32 %v2936_v4, 16  ;;  %v417_v20 = vshll.u32 %v2936_v4, 16  ;;  %714 = vst [vmem:[#allocation2 + $0xc] sm:$0xf] %v713_v16  ;;  %v408_v24 = vrot.slane %v406_v12, 7 }
  0x47   : > { %v403_v21 = vsel %vm3383_vm13, %v395_v7, %v402_v10  ;;  %v547_v22 = vor.u32 %v545_v3, %v544_v11  ;;  %v548_v23 = vrot.slane %v544_v11, 4  ;;  %v2947_v28 = vpack.c.bf16 %v271_v14, %v271_v14 }
  0x48   : > { %716 = vst.msk [vmem:[#allocation2 + $0x10] sm:$0xf] %vm709_vm10, %v403_v21  ;;  %v555_v25 = vor.u32 %v553_v9, %v3401_v17  ;;  %v3407_v26 = vrot.slane %v414_v19, 7  ;;  %v2948_v29 = vpack.c.bf16 %v272_v15, %v272_v15  ;;  %v3409_v30 = vld [vmem:[#allocation2 + $0x6c] sm:$0xf]  ;;  %v411_v33 = vor.u32 %v409_v13, %v408_v24 }
  0x49   : > { %v779_v32 = vsel %vm3372_vm12, %v547_v22, %v778_v18  ;;  %v412_v34 = vrot.slane %v408_v24, 4  ;;  %v404_v35 = vrot.slane %v399_v0, 4  ;;  %v1101_v40 = vshrl.u32 %v3409_v30, 16  ;;  %v726_v21 = vld [vmem:[#allocation2 + $0x20] sm:$0x1] }
  0x4a   : > { %v3419_v37 = vld [vmem:[#allocation2 + $0x70] sm:$0xf]  ;;  %v556_v41 = vsel %vm3383_vm13, %v548_v23, %v555_v25  ;;  %780 = vst [vmem:[#allocation2 + $0x78] sm:$0xf] %v779_v32  ;;  %v419_v42 = vor.u32 %v417_v20, %v3407_v26  ;;  %v1104_v45 = vshll.u32 %v3409_v30, 16  ;;  %v723_v47 = vsel %vm3372_vm12, %v411_v33, %v722_v27 }
  0x4b   : > { %v3427_v44 = vcombine.low %v3409_v30, %v3419_v37  ;;  %781 = vst.msk [vmem:[#allocation2 + $0x7c] sm:$0xf] %vm709_vm10, %v556_v41  ;;  %v508_v48 = vshrl.u32 %v2947_v28, 16  ;;  %724 = vst [vmem:[#allocation2 + $0x18] sm:$0xf] %v723_v47  ;;  %v511_v50 = vshll.u32 %v2947_v28, 16  ;;  %v720_v57 = vsel %vm3415_vm15, %v404_v35, %v719_v43 }
  0x4c   : > { %v420_v49 = vsel %vm3383_vm13, %v412_v34, %v419_v42  ;;  %v516_v51 = vshrl.u32 %v2948_v29, 16  ;;  %v519_v52 = vshll.u32 %v2948_v29, 16  ;;  %v1114_v54 = vshrl.u32 %v3419_v37, 16  ;;  %721 = vst [vmem:[#allocation2 + $0x14] sm:$0x1] %v720_v57 }
  0x4d   : > { %1726 = vrot.lane.b32.xlu1 %v3427_v44, %s3202_s11  ;;  %725 = vst.msk [vmem:[#allocation2 + $0x1c] sm:$0xf] %vm709_vm10, %v420_v49  ;;  %v510_v55 = vrot.slane %v508_v48, 7  ;;  %v540_v58 = vrot.slane %v3369_v38, 4  ;;  %v830_v60 = vld [vmem:[#allocation2 + $0xc] sm:$0xf] }
  0x4e   : > { %v518_v61 = vrot.slane %v516_v51, 7  ;;  %v2811_v62 = vrot.slane %v3409_v30, 9  ;;  %v1384_v63 = vrot.slane %v3419_v37, 5  ;;  %v421_v0 = vrot.slane %v3407_v26, 4 }
  0x4f   : > { %v831_v1 = vld [vmem:[#allocation2 + $0x10] sm:$0xf]  ;;  %v909_v2 = vshrl.u32 %v830_v60, 16  ;;  %v513_v3 = vor.u32 %v511_v50, %v510_v55  ;;  %v514_v4 = vrot.slane %v510_v55, 4  ;;  %v3445_v5 = vrot.slane %v1101_v40, 4 }
  0x50   : > { %v3447_v7 = vcombine.low %v830_v60, %v831_v1  ;;  %v912_v8 = vshll.u32 %v830_v60, 16  ;;  %v521_v38 = vor.u32 %v519_v52, %v518_v61  ;;  %v523_v9 = vrot.slane %v518_v61, 4 }
  0x51   : > { %v3449_v10 = vld [vmem:[#allocation2 + $0x78] sm:$0xf]  ;;  %v765_v11 = vsel %vm3372_vm12, %v513_v3, %v764_v53  ;;  %v2803_v12 = vrot.slane %v830_v60, 9  ;;  %v1328_v13 = vrot.slane %v831_v1, 5  ;;  %v776_v14 = vsel %vm3415_vm15, %v540_v58, %v775_v59  ;;  %v261_v59 = vld [vmem:[%s3291_s7 + $0x20] sm:$0xff] }
  0x52   : > { %v922_v15 = vshrl.u32 %v831_v1, 16  ;;  %1710 = vrot.lane.b32.xlu0 %v3447_v7, %s3202_s11  ;;  %v3457_v16 = vld [vmem:[#allocation2 + $0x7c] sm:$0xf]  ;;  %v1125_v18 = vshrl.u32 %v3449_v10, 16  ;;  %v522_v19 = vsel %vm3383_vm13, %v514_v4, %v521_v38  ;;  %766 = vst [vmem:[#allocation2 + $0x60] sm:$0xf] %v765_v11  ;;  %v769_v20 = vsel %vm3415_vm15, %v523_v9, %v768_v56 }
  0x53   : > { %777 = vst [vmem:[#allocation2 + $0x74] sm:$0x1] %v776_v14  ;;  %v1128_v22 = vshll.u32 %v3449_v10, 16  ;;  %v1138_v23 = vshrl.u32 %v3457_v16, 16  ;;  %v3468_v24 = vcombine.low %v3449_v10, %v3457_v16  ;;  %v3470_v25 = vld [vmem:[#allocation2 + $0x18] sm:$0xf]  ;;  %v1329_v26 = vsel %vm3350_vm4, %v2803_v12, %v1328_v13 }
  0x54   : > { %767 = vst.msk [vmem:[#allocation2 + $0x64] sm:$0xf] %vm709_vm10, %v522_v19  ;;  %770 = vst [vmem:[#allocation2 + $0x68] sm:$0x1] %v769_v20  ;;  %v3475_v27 = vld [vmem:[#allocation2 + $0x1c] sm:$0xf]  ;;  %v727_v51 = vsel %vm3415_vm15, %v421_v0, %v726_v21  ;;  %v1385_v0 = vsel %vm3350_vm4, %v2811_v62, %v1384_v63 }
  0x55   : > { %v933_v28 = vshrl.u32 %v3470_v25, 16  ;;  %v936_v29 = vshll.u32 %v3470_v25, 16  ;;  %v1330_v32 = vrot.slane %v1328_v13, 4  ;;  %v1386_v33 = vrot.slane %v1384_v63, 4  ;;  %1728 = vrot.lane.b32.xlu1 %v3468_v24, %s3202_s11  ;;  %v832_v40 = vld [vmem:[#allocation2 + $0x14] sm:$0x1] }
  0x56   : > { %v946_v34 = vshrl.u32 %v3475_v27, 16  ;;  %v3484_v35 = vcombine.low %v3470_v25, %v3475_v27  ;;  %v911_v41 = vrot.slane %v909_v2, 4  ;;  %v914_v42 = vrot.slane %v912_v8, 5  ;;  %728 = vst [vmem:[#allocation2 + $0x20] sm:$0x1] %v727_v51 }
  0x57   : > { %v1331_v43 = vrot.slane %v832_v40, 5  ;;  %v918_v47 = vshll.u32 %v831_v1, 16  ;;  %v924_v48 = vrot.slane %v922_v15, 4  ;;  %v928_v49 = vshll.u32 %v832_v40, 16 }
  0x58   : > { %1712 = vrot.lane.b32.xlu0 %v3484_v35, %s3202_s11  ;;  %v915_v50 = vor.u32 %v914_v42, %v911_v41  ;;  %v935_v52 = vrot.slane %v933_v28, 4  ;;  %v938_v53 = vrot.slane %v936_v29, 5  ;;  %v942_v58 = vshll.u32 %v3475_v27, 16 }
  0x59   : > { %v1332_v55 = vsel %vm3350_vm4, %v1330_v32, %v1331_v43  ;;  %v920_v56 = vrot.slane %v918_v47, 5  ;;  %v930_v57 = vrot.slane %v928_v49, 5  ;;  %v851_v60 = vld [vmem:[#allocation2 + $0x60] sm:$0xf]  ;;  %v948_v3 = vrot.slane %v946_v34, 4 }
  0x5a   : > { %v3494_v61 = vcombine.low %v1329_v26, %v1332_v55  ;;  %v856_v1 = vld [vmem:[#allocation2 + $0x74] sm:$0x1]  ;;  %v916_v2 = vrot.slane %v915_v50, 4  ;;  %v2810_v38 = vrot.slane %v851_v60, 9  ;;  %v939_v12 = vor.u32 %v938_v53, %v935_v52 }
  0x5b   : > { %v852_v4 = vld [vmem:[#allocation2 + $0x64] sm:$0xf]  ;;  %v853_v8 = vld [vmem:[#allocation2 + $0x68] sm:$0x1]  ;;  %v1387_v9 = vrot.slane %v856_v1, 5  ;;  %v925_v11 = vor.u32 %v924_v48, %v920_v56  ;;  %v1077_v15 = vshrl.u32 %v851_v60, 16  ;;  %v3502_v28 = vpack.c.bf16 %v261_v59, %v261_v59 }
  0x5c   : > { %v1377_v13 = vrot.slane %v852_v4, 5  ;;  %v1380_v14 = vrot.slane %v853_v8, 5  ;;  %1677 = vrot.lane.b32.xlu0 %v3494_v61, %s3200_s9  ;;  %v1080_v19 = vshll.u32 %v851_v60, 16  ;;  %v1086_v20 = vshll.u32 %v852_v4, 16 }
  0x5d   : > { %v1090_v21 = vshrl.u32 %v852_v4, 16  ;;  %v1096_v26 = vshll.u32 %v853_v8, 16  ;;  %v1388_v29 = vsel %vm3350_vm4, %v1386_v33, %v1387_v9  ;;  %v1079_v32 = vrot.slane %v1077_v15, 4  ;;  %v835_v49 = vld [vmem:[#allocation2 + $0x20] sm:$0x1] }
  0x5e   : > { %v1378_v62 = vsel %vm3350_vm4, %v2810_v38, %v1377_v13  ;;  %v1379_v63 = vrot.slane %v1377_v13, 4  ;;  %v1082_v34 = vrot.slane %v1080_v19, 5  ;;  %v1088_v40 = vrot.slane %v1086_v20, 5 }
  0x5f   : > { %v1092_v41 = vrot.slane %v1090_v21, 4  ;;  %v1098_v42 = vrot.slane %v1096_v26, 5  ;;  %v921_v47 = vsel %vm3364_vm9, %v916_v2, %v920_v56  ;;  %v926_v48 = vrot.slane %v925_v11, 4 }
  0x60   : > { %v1381_v43 = vsel %vm3350_vm4, %v1379_v63, %v1380_v14  ;;  %v940_v50 = vrot.slane %v939_v12, 4  ;;  %v1083_v52 = vor.u32 %v1082_v34, %v1079_v32  ;;  %v944_v55 = vrot.slane %v942_v58, 5  ;;  %v262_v63 = vld [vmem:[%s3291_s7 + $0x28] sm:$0xff] }
  0x61   : > { %v3512_v51 = vcombine.low %v1378_v62, %v1381_v43  ;;  %v1093_v53 = vor.u32 %v1092_v41, %v1088_v40  ;;  %v931_v33 = vsel %vm3364_vm9, %v926_v48, %v930_v57  ;;  %v952_v59 = vshll.u32 %v835_v49, 16 }
  0x62   : > { %v1106_v60 = vrot.slane %v1104_v45, 5  ;;  %v1110_v4 = vshll.u32 %v3419_v37, 16  ;;  %v3521_v56 = vcombine.low %v1385_v0, %v1388_v29  ;;  %v1084_v2 = vrot.slane %v1083_v52, 4  ;;  %v782_v37 = vld [vmem:[#allocation2 + $0x80] sm:$0x1] }
  0x63   : > { %1691 = vrot.lane.b32.xlu1 %v3512_v51, %s3200_s9  ;;  %v1094_v8 = vrot.slane %v1093_v53, 4  ;;  %v2837_v38 = vcombine.low %v921_v47, %v931_v33  ;;  %v949_v9 = vor.u32 %v948_v3, %v944_v55  ;;  %v954_v11 = vrot.slane %v952_v59, 5 }
  0x64   : > { %v1107_v58 = vor.u32 %v1106_v60, %v3445_v5  ;;  %v1112_v12 = vrot.slane %v1110_v4, 5  ;;  %v1089_v57 = vsel %vm3364_vm9, %v1084_v2, %v1088_v40  ;;  %v1116_v45 = vrot.slane %v1114_v54, 4  ;;  %v729_v4 = vld [vmem:[#allocation2 + $0x24] sm:$0xf] }
  0x65   : > { %v1099_v30 = vsel %vm3364_vm9, %v1094_v8, %v1098_v42  ;;  %v1120_v13 = vshll.u32 %v856_v1, 16  ;;  %v945_v3 = vsel %vm3364_vm9, %v940_v50, %v944_v55  ;;  %v950_v14 = vrot.slane %v949_v9, 4  ;;  %v277_v50 = vld [vmem:[%s3291_s7 + $0xa0] sm:$0xff]  ;;  %v278_v8 = vld [vmem:[%s3291_s7 + $0xa8] sm:$0xff] }
  0x66   : > { %v3530_v0 = vcombine.low %v1089_v57, %v1099_v30  ;;  %v1108_v15 = vrot.slane %v1107_v58, 4  ;;  %v1117_v5 = vor.u32 %v1116_v45, %v1112_v12  ;;  %v2804_v20 = vrot.slane %v3470_v25, 9  ;;  %v264_v57 = vld [vmem:[%s3291_s7 + $0x38] sm:$0xff] }
  0x67   : > { %1693 = vrot.lane.b32.xlu1 %v3521_v56, %s3200_s9  ;;  %v1122_v19 = vrot.slane %v1120_v13, 5  ;;  %v1335_v21 = vrot.slane %v3475_v27, 5  ;;  %v955_v54 = vsel %vm3364_vm9, %v950_v14, %v954_v11  ;;  %v1338_v1 = vrot.slane %v835_v49, 5  ;;  %v733_v13 = vld [vmem:[#allocation2 + $0x2c] sm:$0x1] }
  0x68   : > { %1611 = vrot.lane.b32.xlu0 %v3530_v0, %s3201_s10  ;;  %v557_v26 = vrot.slane %v3401_v17, 4  ;;  %v1127_v62 = vrot.slane %v1125_v18, 4  ;;  %v3546_v29 = vcombine.low %v945_v3, %v955_v54  ;;  %v1113_v25 = vsel %vm3364_vm9, %v1108_v15, %v1112_v12  ;;  %v263_v12 = vld [vmem:[%s3291_s7 + $0x30] sm:$0xff] }
  0x69   : > { %v1118_v27 = vrot.slane %v1117_v5, 4  ;;  %v1337_v32 = vrot.slane %v1335_v21, 4  ;;  %v1130_v40 = vrot.slane %v1128_v22, 5  ;;  %v1134_v17 = vshll.u32 %v3457_v16, 16 }
  0x6a   : > { %v783_v34 = vsel %vm3415_vm15, %v557_v26, %v782_v37  ;;  %v1140_v18 = vrot.slane %v1138_v23, 4  ;;  %v1336_v42 = vsel %vm3350_vm4, %v2804_v20, %v1335_v21  ;;  %v2938_v43 = vpack.c.bf16 %v262_v63, %v262_v63 }
  0x6b   : > { %1597 = vrot.lane.b32.xlu1 %v2837_v38, %s3201_s10  ;;  %v1123_v41 = vsel %vm3364_vm9, %v1118_v27, %v1122_v19  ;;  %784 = vst [vmem:[#allocation2 + $0x80] sm:$0x1] %v783_v34  ;;  %v423_v47 = vshrl.u32 %v3502_v28, 16  ;;  %v1339_v23 = vsel %vm3350_vm4, %v1337_v32, %v1338_v1  ;;  %v1131_v48 = vor.u32 %v1130_v40, %v1127_v62 }
  0x6c   : > { %1745 = vrot.lane.b32.xlu0 %v2837_v38, %s3203_s12  ;;  %v3564_v22 = vcombine.low %v1113_v25, %v1123_v41  ;;  %v3568_v49 = vrot.slane %v1134_v17, 5  ;;  %v426_v53 = vshll.u32 %v3502_v28, 16  ;;  %v431_v55 = vshrl.u32 %v2938_v43, 16  ;;  %v785_v17 = vld [vmem:[#allocation2 + $0x84] sm:$0xf] }
  0x6d   : > { %v425_v52 = vrot.slane %v423_v47, 7  ;;  %v434_v33 = vshll.u32 %v2938_v43, 16  ;;  %v1132_v59 = vrot.slane %v1131_v48, 4  ;;  %v2812_v2 = vrot.slane %v3449_v10, 9 }
  0x6e   : > { %v1141_v60 = vor.u32 %v1140_v18, %v3568_v49  ;;  %v433_v11 = vrot.slane %v431_v55, 7  ;;  %v2953_v58 = vpack.c.bf16 %v277_v50, %v277_v50  ;;  %v3581_v28 = vcombine.low %v1336_v42, %v1339_v23 }
  0x6f   : > { %1613 = vrot.lane.b32.xlu1 %v3564_v22, %s3201_s10  ;;  %v428_v38 = vor.u32 %v426_v53, %v425_v52  ;;  %v429_v9 = vrot.slane %v425_v52, 4  ;;  %v1137_v30 = vsel %vm3364_vm9, %v1132_v59, %v3568_v49  ;;  %v1391_v45 = vrot.slane %v3457_v16, 5 }
  0x70   : > { %1747 = vrot.lane.b32.xlu0 %v3546_v29, %s3203_s12  ;;  %v1142_v10 = vrot.slane %v1141_v60, 4  ;;  %v436_v3 = vor.u32 %v434_v33, %v433_v11  ;;  %v438_v15 = vrot.slane %v433_v11, 4  ;;  %v2954_v5 = vpack.c.bf16 %v278_v8, %v278_v8  ;;  %v736_v60 = vld [vmem:[#allocation2 + $0x30] sm:$0xf] }
  0x71   : > { %v730_v14 = vsel %vm3372_vm12, %v428_v38, %v729_v4  ;;  %v559_v20 = vshrl.u32 %v2953_v58, 16  ;;  %v562_v21 = vshll.u32 %v2953_v58, 16  ;;  %v2939_v37 = vpack.c.bf16 %v263_v12, %v263_v12  ;;  %v740_v4 = vld [vmem:[#allocation2 + $0x38] sm:$0x1] }
  0x72   : > { %v859_v19 = vld [vmem:[#allocation2 + $0x80] sm:$0x1]  ;;  %731 = vst [vmem:[#allocation2 + $0x24] sm:$0xf] %v730_v14  ;;  %v2940_v54 = vpack.c.bf16 %v264_v57, %v264_v57  ;;  %v437_v16 = vsel %vm3383_vm13, %v429_v9, %v436_v3  ;;  %v3595_v26 = vsel %vm3350_vm4, %v2812_v2, %v1391_v45  ;;  %v734_v62 = vsel %vm3415_vm15, %v438_v15, %v733_v13 }
  0x73   : > { %1761 = vrot.lane.b32.xlu1 %v3564_v22, %s3203_s12  ;;  %v1144_v1 = vshll.u32 %v859_v19, 16  ;;  %732 = vst.msk [vmem:[#allocation2 + $0x28] sm:$0xf] %vm709_vm10, %v437_v16  ;;  %735 = vst [vmem:[#allocation2 + $0x2c] sm:$0x1] %v734_v62  ;;  %v561_v63 = vrot.slane %v559_v20, 7 }
  0x74   : > { %1780 = vrot.lane.b32.xlu0 %v3494_v61, %s3204_s13  ;;  %v567_v25 = vshrl.u32 %v2954_v5, 16  ;;  %v570_v27 = vshll.u32 %v2954_v5, 16  ;;  %v440_v32 = vshrl.u32 %v2939_v37, 16  ;;  %v1393_v40 = vrot.slane %v1391_v45, 4  ;;  %v789_v61 = vld [vmem:[#allocation2 + $0x8c] sm:$0x1] }
  0x75   : > { %v1146_v34 = vrot.slane %v1144_v1, 5  ;;  %v443_v18 = vshll.u32 %v2939_v37, 16  ;;  %v448_v41 = vshrl.u32 %v2940_v54, 16  ;;  %v1394_v42 = vrot.slane %v859_v19, 5  ;;  %v279_v5 = vld [vmem:[%s3291_s7 + $0xb0] sm:$0xff] }
  0x76   : > { %v564_v43 = vor.u32 %v562_v21, %v561_v63  ;;  %v565_v47 = vrot.slane %v561_v63, 4  ;;  %v569_v23 = vrot.slane %v567_v25, 7  ;;  %v442_v49 = vrot.slane %v440_v32, 7 }
  0x77   : > { %v1147_v48 = vsel %vm3364_vm9, %v1142_v10, %v1146_v34  ;;  %v450_v50 = vrot.slane %v448_v41, 7  ;;  %v451_v52 = vshll.u32 %v2940_v54, 16  ;;  %v1395_v45 = vsel %vm3350_vm4, %v1393_v40, %v1394_v42  ;;  %v3124_v54 = vld [vmem:[%s4757_s1] sm:$0xff]   ;;  %v280_v42 = vld [vmem:[%s3291_s7 + $0xb8] sm:$0xff] }
  0x78   : > { %1782 = vrot.lane.b32.xlu0 %v3581_v28, %s3204_s13  ;;  %v3606_v53 = vcombine.low %v1137_v30, %v1147_v48  ;;  %v572_v55 = vor.u32 %v570_v27, %v569_v23  ;;  %v786_v33 = vsel %vm3372_vm12, %v564_v43, %v785_v17  ;;  %v574_v59 = vrot.slane %v569_v23, 4  ;;  %3017 = vmatprep.subr.bf16.mxu0 %v3124_v54  ;;  %v3125_v43 = vld [vmem:[%s4757_s1 + $0x8] sm:$0xff]  }
  0x79   : > { %v3610_v2 = vld [vmem:[#allocation2 + $0x24] sm:$0xf]  ;;  %787 = vst [vmem:[#allocation2 + $0x84] sm:$0xf] %v786_v33  ;;  %v445_v8 = vor.u32 %v443_v18, %v442_v49  ;;  %v446_v38 = vrot.slane %v442_v49, 4  ;;  %v453_v9 = vor.u32 %v451_v52, %v450_v50  ;;  %v455_v11 = vrot.slane %v450_v50, 4  ;;  %3018 = vmatpush3.bf16.msra.mxu0 %v3124_v54  ;;  %3055 = vmatprep.subr.bf16.mxu1 %v3124_v54 }
  0x7a   : > { %1763 = vrot.lane.b32.xlu1 %v3606_v53, %s3203_s12  ;;  %v957_v58 = vshrl.u32 %v3610_v2, 16  ;;  %v960_v12 = vshll.u32 %v3610_v2, 16  ;;  %v573_v57 = vsel %vm3383_vm13, %v565_v47, %v572_v55  ;;  %v790_v30 = vsel %vm3415_vm15, %v574_v59, %v789_v61  ;;  %v3620_v10 = vld [vmem:[#allocation2 + $0x28] sm:$0xf]  ;;  %v3624_v13 = vld [vmem:[#allocation2 + $0x2c] sm:$0x1]  ;;  %3058 = vmatpush3.bf16.msra.mxu1 %v3124_v54 }
  0x7b   : > { %788 = vst.msk [vmem:[#allocation2 + $0x88] sm:$0xf] %vm709_vm10, %v573_v57  ;;  %791 = vst [vmem:[#allocation2 + $0x8c] sm:$0x1] %v790_v30  ;;  %v454_v3 = vsel %vm3383_vm13, %v446_v38, %v453_v9  ;;  %v737_v14 = vsel %vm3372_vm12, %v445_v8, %v736_v60  ;;  %v741_v15 = vsel %vm3415_vm15, %v455_v11, %v740_v4  ;;  %v970_v19 = vshrl.u32 %v3620_v10, 16 }
  0x7c   : > { %1815 = vrot.lane.b32.xlu0 %v3484_v35, %s3205_s14  ;;  %v3639_v20 = vcombine.low %v3610_v2, %v3620_v10  ;;  %v959_v21 = vrot.slane %v957_v58, 4  ;;  %v962_v37 = vrot.slane %v960_v12, 5  ;;  %738 = vst [vmem:[#allocation2 + $0x30] sm:$0xf] %v737_v14  ;;  %739 = vst.msk [vmem:[#allocation2 + $0x34] sm:$0xf] %vm709_vm10, %v454_v3  ;;  %v3650_v62 = vcombine.low %v3595_v26, %v1395_v45 }
  0x7d   : > { %742 = vst [vmem:[#allocation2 + $0x38] sm:$0x1] %v741_v15  ;;  %v966_v1 = vshll.u32 %v3620_v10, 16  ;;  %v976_v16 = vshll.u32 %v3624_v13, 16  ;;  %v972_v25 = vrot.slane %v970_v19, 4  ;;  %v2955_v27 = vpack.c.bf16 %v279_v5, %v279_v5  ;;  %3019 = vmatprep.subr.bf16.mxu0 %v3125_v43  ;;  %3056 = vmatprep.subr.bf16.mxu1 %v3125_v43 }
  0x7e   : > { %1796 = vrot.lane.b32.xlu1 %v3521_v56, %s3204_s13  ;;  %v963_v63 = vor.u32 %v962_v37, %v959_v21  ;;  %v2956_v60 = vpack.c.bf16 %v280_v42, %v280_v42  ;;  %3020 = vmatpush3.bf16.msra.mxu0 %v3125_v43  ;;  %v1342_v38 = vrot.slane %v3620_v10, 5  ;;  %v2805_v15 = vrot.slane %v3610_v2, 9  ;;  %v792_v37 = vld [vmem:[#allocation2 + $0x90] sm:$0xf] }
  0x7f   : > { %v968_v32 = vrot.slane %v966_v1, 5  ;;  %v978_v18 = vrot.slane %v976_v16, 5  ;;  %v576_v48 = vshrl.u32 %v2955_v27, 16  ;;  %3059 = vmatpush3.bf16.msra.mxu1 %v3125_v43  ;;  %v579_v30 = vshll.u32 %v2955_v27, 16 }
  0x80   : > { %1817 = vrot.lane.b32.xlu0 %v3639_v20, %s3205_s14  ;;  %v964_v34 = vrot.slane %v963_v63, 4  ;;  %v3654_v40 = vld [vmem:[#allocation2 + $0x84] sm:$0xf]  ;;  %v584_v14 = vshrl.u32 %v2956_v60, 16  ;;  %v1344_v5 = vrot.slane %v1342_v38, 4  ;;  %v1345_v19 = vrot.slane %v3624_v13, 5 }
  0x81   : > { %v973_v17 = vor.u32 %v972_v25, %v968_v32  ;;  %v1149_v26 = vshrl.u32 %v3654_v40, 16  ;;  %v1152_v41 = vshll.u32 %v3654_v40, 16  ;;  %v578_v57 = vrot.slane %v576_v48, 7  ;;  %v265_v25 = vld [vmem:[%s3291_s7 + $0x40] sm:$0xff] }
  0x82   : > { %1798 = vrot.lane.b32.xlu1 %v3650_v62, %s3204_s13  ;;  %v3664_v47 = vld [vmem:[#allocation2 + $0x88] sm:$0xf]  ;;  %v3666_v23 = vld [vmem:[#allocation2 + $0x8c] sm:$0x1]  ;;  %v969_v61 = vsel %vm3364_vm9, %v964_v34, %v968_v32  ;;  %v586_v63 = vrot.slane %v584_v14, 7  ;;  %v587_v13 = vshll.u32 %v2956_v60, 16  ;;  %v1343_v27 = vsel %vm3350_vm4, %v2805_v15, %v1342_v38 }
  0x83   : > { %v974_v49 = vrot.slane %v973_v17, 4  ;;  %v1162_v50 = vshrl.u32 %v3664_v47, 16  ;;  %v1151_v52 = vrot.slane %v1149_v26, 4  ;;  %v1154_v55 = vrot.slane %v1152_v41, 5  ;;  %v266_v17 = vld [vmem:[%s3291_s7 + $0x48] sm:$0xff] }
  0x84   : > { %1850 = vrot.lane.b32.xlu0 %v3546_v29, %s3206_s29  ;;  %v1158_v33 = vshll.u32 %v3664_v47, 16  ;;  %v1168_v59 = vshll.u32 %v3666_v23, 16  ;;  %v3684_v11 = vcombine.low %v3654_v40, %v3664_v47  ;;  %v581_v1 = vor.u32 %v579_v30, %v578_v57  ;;  %v796_v41 = vld [vmem:[#allocation2 + $0x98] sm:$0x1]  ;;  %v743_v30 = vld [vmem:[#allocation2 + $0x3c] sm:$0xf] }
  0x85   : > { %v979_v4 = vsel %vm3364_vm9, %v974_v49, %v978_v18  ;;  %v1164_v8 = vrot.slane %v1162_v50, 4  ;;  %v1155_v58 = vor.u32 %v1154_v55, %v1151_v52  ;;  %v582_v16 = vrot.slane %v578_v57, 4  ;;  %v281_v52 = vld [vmem:[%s3291_s7 + $0xc0] sm:$0xff]  ;;  %v3732_v15 = vld [vmem:[#allocation2 + $0x34] sm:$0xf] }
  0x86   : > { %1831 = vrot.lane.b32.xlu1 %v3468_v24, %s3205_s14  ;;  %v3680_v9 = vcombine.low %v969_v61, %v979_v4  ;;  %v1160_v12 = vrot.slane %v1158_v33, 5  ;;  %v1170_v10 = vrot.slane %v1168_v59, 5  ;;  %v1346_v32 = vsel %vm3350_vm4, %v1344_v5, %v1345_v19  ;;  %v282_v4 = vld [vmem:[%s3291_s7 + $0xc8] sm:$0xff] }
  0x87   : > { %v1156_v45 = vrot.slane %v1155_v58, 4  ;;  %v793_v34 = vsel %vm3372_vm12, %v581_v1, %v792_v37  ;;  %v589_v26 = vor.u32 %v587_v13, %v586_v63  ;;  %v1398_v42 = vrot.slane %v3664_v47, 5 }
  0x88   : > { %1852 = vrot.lane.b32.xlu0 %v3680_v9, %s3206_s29  ;;  %v1165_v3 = vor.u32 %v1164_v8, %v1160_v12  ;;  %794 = vst [vmem:[#allocation2 + $0x90] sm:$0xf] %v793_v34  ;;  %v591_v43 = vrot.slane %v586_v63, 4  ;;  %v2941_v48 = vpack.c.bf16 %v265_v25, %v265_v25  ;;  %v3713_v61 = vcombine.low %v1343_v27, %v1346_v32 }
  0x89   : > { %v1161_v54 = vsel %vm3364_vm9, %v1156_v45, %v1160_v12  ;;  %v590_v49 = vsel %vm3383_vm13, %v582_v16, %v589_v26  ;;  %v2942_v50 = vpack.c.bf16 %v266_v17, %v266_v17  ;;  %v2813_v59 = vrot.slane %v3654_v40, 9  ;;  %v3728_v45 = vld [vmem:[#allocation2 + $0x30] sm:$0xf] }
  0x8a   : > { %1833 = vrot.lane.b32.xlu1 %v3684_v11, %s3205_s14  ;;  %v1166_v21 = vrot.slane %v1165_v3, 4  ;;  %795 = vst.msk [vmem:[#allocation2 + $0x94] sm:$0xf] %vm709_vm10, %v590_v49  ;;  %v797_v55 = vsel %vm3415_vm15, %v591_v43, %v796_v41  ;;  %v457_v33 = vshrl.u32 %v2941_v48, 16  ;;  %v460_v47 = vshll.u32 %v2941_v48, 16 }
  0x8b   : > { %798 = vst [vmem:[#allocation2 + $0x98] sm:$0x1] %v797_v55  ;;  %v468_v60 = vshll.u32 %v2942_v50, 16  ;;  %v1400_v8 = vrot.slane %v1398_v42, 4  ;;  %v1401_v38 = vrot.slane %v3666_v23, 5  ;;  %v2957_v12 = vpack.c.bf16 %v281_v52, %v281_v52 }
  0x8c   : > { %1885 = vrot.lane.b32.xlu0 %v3581_v28, %s3207_s30  ;;  %v1171_v2 = vsel %vm3364_vm9, %v1166_v21, %v1170_v10  ;;  %v459_v58 = vrot.slane %v457_v33, 7  ;;  %v2958_v14 = vpack.c.bf16 %v282_v4, %v282_v4  ;;  %v1399_v23 = vsel %vm3350_vm4, %v2813_v59, %v1398_v42  ;;  %v799_v41 = vld [vmem:[#allocation2 + $0x9c] sm:$0xf]  ;;  %v841_v33 = vld [vmem:[#allocation2 + $0x38] sm:$0x1] }
  0x8d   : > { %v3708_v18 = vcombine.low %v1161_v54, %v1171_v2  ;;  %v593_v40 = vshrl.u32 %v2957_v12, 16  ;;  %v1402_v19 = vsel %vm3350_vm4, %v1400_v8, %v1401_v38  ;;  %v747_v54 = vld [vmem:[#allocation2 + $0x44] sm:$0x1]  ;;  %v981_v1 = vshrl.u32 %v3728_v45, 16 }
  0x8e   : > { %1866 = vrot.lane.b32.xlu1 %v3606_v53, %s3206_s29  ;;  %v462_v3 = vor.u32 %v460_v47, %v459_v58  ;;  %v463_v10 = vrot.slane %v459_v58, 4  ;;  %v596_v63 = vshll.u32 %v2957_v12, 16  ;;  %v984_v13 = vshll.u32 %v3728_v45, 16  ;;  %v803_v58 = vld [vmem:[#allocation2 + $0xa4] sm:$0x1] }
  0x8f   : > { %v595_v16 = vrot.slane %v593_v40, 7  ;;  %v994_v25 = vshrl.u32 %v3732_v15, 16  ;;  %v990_v27 = vshll.u32 %v3732_v15, 16  ;;  %v601_v32 = vshrl.u32 %v2958_v14, 16  ;;  %v3757_v43 = vld [vmem:[#allocation2 + $0x90] sm:$0xf] }
  0x90   : > { %1599 = vrot.lane.b32.xlu0 %v3546_v29, %s3201_s10  ;;  %v465_v29 = vshrl.u32 %v2942_v50, 16  ;;  %v744_v21 = vsel %vm3372_vm12, %v462_v3, %v743_v30  ;;  %v3751_v34 = vcombine.low %v1399_v23, %v1402_v19  ;;  %v604_v26 = vshll.u32 %v2958_v14, 16  ;;  %v267_v3 = vld [vmem:[%s3291_s7 + $0x50] sm:$0xff]  ;;  %v268_v19 = vld [vmem:[%s3291_s7 + $0x58] sm:$0xff] }
  0x91   : > { %745 = vst [vmem:[#allocation2 + $0x3c] sm:$0xf] %v744_v21  ;;  %v983_v42 = vrot.slane %v981_v1, 4  ;;  %v598_v48 = vor.u32 %v596_v63, %v595_v16  ;;  %v986_v49 = vrot.slane %v984_v13, 5  ;;  %v992_v50 = vrot.slane %v990_v27, 5 }
  0x92   : > { %1868 = vrot.lane.b32.xlu1 %v3708_v18, %s3206_s29  ;;  %v467_v57 = vrot.slane %v465_v29, 7  ;;  %v996_v52 = vrot.slane %v994_v25, 4  ;;  %v3759_v55 = vld [vmem:[#allocation2 + $0x94] sm:$0xf]  ;;  %v599_v47 = vrot.slane %v595_v16, 4  ;;  %v1176_v29 = vshll.u32 %v3757_v43, 16 }
  0x93   : > { %v800_v59 = vsel %vm3372_vm12, %v598_v48, %v799_v41  ;;  %v1186_v8 = vshrl.u32 %v3759_v55, 16  ;;  %v1182_v38 = vshll.u32 %v3759_v55, 16  ;;  %v987_v12 = vor.u32 %v986_v49, %v983_v42  ;;  %v3789_v13 = vld [vmem:[#allocation2 + $0x98] sm:$0x1] }
  0x94   : > { %1887 = vrot.lane.b32.xlu0 %v3713_v61, %s3207_s30  ;;  %v470_v5 = vor.u32 %v468_v60, %v467_v57  ;;  %v472_v37 = vrot.slane %v467_v57, 4  ;;  %801 = vst [vmem:[#allocation2 + $0x9c] sm:$0xf] %v800_v59  ;;  %v997_v57 = vor.u32 %v996_v52, %v992_v50  ;;  %v1000_v30 = vshll.u32 %v841_v33, 16 }
  0x95   : > { %v1349_v14 = vrot.slane %v3732_v15, 5  ;;  %v3785_v21 = vcombine.low %v3728_v45, %v3732_v15  ;;  %v2943_v1 = vpack.c.bf16 %v267_v3, %v267_v3  ;;  %v2944_v25 = vpack.c.bf16 %v268_v19, %v268_v19 }
  0x96   : > { %1901 = vrot.lane.b32.xlu1 %v3650_v62, %s3207_s30  ;;  %v471_v2 = vsel %vm3383_vm13, %v463_v10, %v470_v5  ;;  %v748_v17 = vsel %vm3415_vm15, %v472_v37, %v747_v54  ;;  %v1178_v5 = vrot.slane %v1176_v29, 5  ;;  %v3787_v37 = vrot.slane %v1182_v38, 5 }
  0x97   : > { %746 = vst.msk [vmem:[#allocation2 + $0x40] sm:$0xf] %vm709_vm10, %v471_v2  ;;  %749 = vst [vmem:[#allocation2 + $0x44] sm:$0x1] %v748_v17  ;;  %v1188_v54 = vrot.slane %v1186_v8, 4  ;;  %v988_v2 = vrot.slane %v987_v12, 4 }
  0x98   : > { %1601 = vrot.lane.b32.xlu0 %v3680_v9, %s3201_s10  ;;  %4778 = vst [vmem:[#allocation6_spill] sm:$0xff] %v3785_v21  ;;  %v998_v16 = vrot.slane %v997_v57, 4  ;;  %v1002_v63 = vrot.slane %v1000_v30, 5  ;;  %v474_v27 = vshrl.u32 %v2943_v1, 16  ;;  %v1351_v17 = vrot.slane %v1349_v14, 4  ;;  %v283_v12 = vld [vmem:[%s3291_s7 + $0xd0] sm:$0xff] }
  0x99   : > { %v1352_v15 = vrot.slane %v841_v33, 5  ;;  %v1189_v41 = vor.u32 %v1188_v54, %v3787_v37  ;;  %v1192_v42 = vshll.u32 %v3789_v13, 16  ;;  %v477_v49 = vshll.u32 %v2943_v1, 16  ;;  %v284_v57 = vld [vmem:[%s3291_s7 + $0xd8] sm:$0xff] }
  0x9a   : > { %1615 = vrot.lane.b32.xlu1 %v3606_v53, %s3201_s10  ;;  %v603_v53 = vrot.slane %v601_v32, 7  ;;  %v2806_v32 = vrot.slane %v3728_v45, 9  ;;  %v476_v48 = vrot.slane %v474_v27, 7  ;;  %v993_v52 = vsel %vm3364_vm9, %v988_v2, %v992_v50 }
  0x9b   : > { %v1190_v29 = vrot.slane %v1189_v41, 4  ;;  %v3820_v30 = vcombine.low %v3757_v43, %v3759_v55  ;;  %v2959_v2 = vpack.c.bf16 %v283_v12, %v283_v12  ;;  %vm2250_vm0 = vcmask 1041408  }
  0x9c   : > { %1679 = vrot.lane.b32.xlu0 %v3581_v28, %s3200_s9  ;;  %v1173_v28 = vshrl.u32 %v3757_v43, 16  ;;  %v606_v60 = vor.u32 %v604_v26, %v603_v53  ;;  %v608_v4 = vrot.slane %v603_v53, 4  ;;  %v479_v45 = vor.u32 %v477_v49, %v476_v48 }
  0x9d   : > { %v482_v53 = vshrl.u32 %v2944_v25, 16  ;;  %v1350_v33 = vsel %vm3350_vm4, %v2806_v32, %v1349_v14  ;;  %v480_v38 = vrot.slane %v476_v48, 4  ;;  %4779 = vst [vmem:[#allocation7_spill] sm:$0xff] %v3820_v30  ;;  %v1408_v49 = vrot.slane %v3789_v13, 5  ;;  %v3861_v13 = vld [vmem:[#allocation2 + $0x9c] sm:$0xf] }
  0x9e   : > { %1903 = vrot.lane.b32.xlu1 %v3751_v34, %s3207_s30  ;;  %v607_v10 = vsel %vm3383_vm13, %v599_v47, %v606_v60  ;;  %v1175_v40 = vrot.slane %v1173_v28, 4  ;;  %v804_v23 = vsel %vm3415_vm15, %v608_v4, %v803_v58  ;;  %v1353_v47 = vsel %vm3350_vm4, %v1351_v17, %v1352_v15  ;;  %v750_v28 = vld [vmem:[#allocation2 + $0x48] sm:$0xf]  ;;  %v3812_v4 = vld [vmem:[#allocation2 + $0x3c] sm:$0xf] }
  0x9f   : > { %802 = vst.msk [vmem:[#allocation2 + $0xa0] sm:$0xf] %vm709_vm10, %v607_v10  ;;  %805 = vst [vmem:[#allocation2 + $0xa4] sm:$0x1] %v804_v23  ;;  %v1194_v60 = vrot.slane %v1192_v42, 5  ;;  %v484_v8 = vrot.slane %v482_v53, 7  ;;  %v751_v14 = vsel %vm3372_vm12, %v479_v45, %v750_v28 }
  0xa0   : > { %1681 = vrot.lane.b32.xlu0 %v3713_v61, %s3200_s9  ;;  %v1179_v26 = vor.u32 %v1178_v5, %v1175_v40  ;;  %v485_v58 = vshll.u32 %v2944_v25, 16  ;;  %v3824_v3 = vld [vmem:[#allocation2 + $0x40] sm:$0xf]  ;;  %v1405_v10 = vrot.slane %v3759_v55, 5  ;;  %v754_v40 = vld [vmem:[#allocation2 + $0x50] sm:$0x1] }
  0xa1   : > { %v1005_v23 = vshrl.u32 %v3812_v4, 16  ;;  %752 = vst [vmem:[#allocation2 + $0x48] sm:$0xf] %v751_v14  ;;  %v489_v54 = vrot.slane %v484_v8, 4  ;;  %v1195_v1 = vsel %vm3364_vm9, %v1190_v29, %v1194_v60  ;;  %v1008_v55 = vshll.u32 %v3812_v4, 16 }
  0xa2   : > { %1617 = vrot.lane.b32.xlu1 %v3708_v18, %s3201_s10  ;;  %v1180_v59 = vrot.slane %v1179_v26, 4  ;;  %v487_v19 = vor.u32 %v485_v58, %v484_v8  ;;  %v1018_v25 = vshrl.u32 %v3824_v3, 16  ;;  %v610_v17 = vshrl.u32 %v2959_v2, 16  ;;  %v3855_v53 = vld [vmem:[#allocation2 + $0x44] sm:$0x1] }
  0xa3   : > { %v755_v32 = vsel %vm3415_vm15, %v489_v54, %v754_v40  ;;  %v613_v15 = vshll.u32 %v2959_v2, 16  ;;  %v2814_v42 = vrot.slane %v3757_v43, 9  ;;  %v1407_v48 = vrot.slane %v1405_v10, 4  ;;  %v806_v43 = vld [vmem:[#allocation2 + $0xa8] sm:$0xf] }
  0xa4   : > { %1714 = vrot.lane.b32.xlu0 %v3639_v20, %s3202_s11  ;;  %v1185_v5 = vsel %vm3364_vm9, %v1180_v59, %v3787_v37  ;;  %v1014_v37 = vshll.u32 %v3824_v3, 16  ;;  %v488_v27 = vsel %vm3383_vm13, %v480_v38, %v487_v19  ;;  %756 = vst [vmem:[#allocation2 + $0x50] sm:$0x1] %v755_v32  ;;  %v1010_v28 = vrot.slane %v1008_v55, 5 }
  0xa5   : > { %753 = vst.msk [vmem:[#allocation2 + $0x4c] sm:$0xf] %vm709_vm10, %v488_v27  ;;  %v3853_v45 = vcombine.low %v1185_v5, %v1195_v1  ;;  %v1020_v60 = vrot.slane %v1018_v25, 4  ;;  %v1409_v14 = vsel %vm3350_vm4, %v1407_v48, %v1408_v49  ;;  %v1024_v40 = vshll.u32 %v3855_v53, 16  ;;  %v285_v27 = vld [vmem:[%s3291_s7 + $0xe0] sm:$0xff] }
  0xa6   : > { %1695 = vrot.lane.b32.xlu1 %v3650_v62, %s3200_s9  ;;  %v1003_v62 = vsel %vm3364_vm9, %v998_v16, %v1002_v63  ;;  %v2960_v16 = vpack.c.bf16 %v284_v57, %v284_v57  ;;  %v269_v63 = vld [vmem:[%s3291_s7 + $0x60] sm:$0xff]  ;;  %v3857_v29 = vrot.slane %v1014_v37, 5  ;;  %v1406_v57 = vsel %vm3350_vm4, %v2814_v42, %v1405_v10  ;;  %v810_v10 = vld [vmem:[#allocation2 + $0xb0] sm:$0x1]  ;;  %v757_v37 = vld [vmem:[#allocation2 + $0x54] sm:$0xf] }
  0xa7   : > { %v3810_v50 = vcombine.low %v993_v52, %v1003_v62  ;;  %v270_v52 = vld [vmem:[%s3291_s7 + $0x68] sm:$0xff]  ;;  %v2945_v62 = vpack.c.bf16 %v269_v63, %v269_v63  ;;  %v3881_v63 = vcombine.low %v1406_v57, %v1409_v14  ;;  %v1200_v32 = vshll.u32 %v3861_v13, 16  ;;  %v3908_v57 = vld [vmem:[#allocation2 + $0xa4] sm:$0x1] }
  0xa8   : > { %1716 = vrot.lane.b32.xlu0 %v3785_v21, %s3202_s11  ;;  %v618_v26 = vshrl.u32 %v2960_v16, 16  ;;  %v621_v41 = vshll.u32 %v2960_v16, 16  ;;  %v2946_v12 = vpack.c.bf16 %v270_v52, %v270_v52  ;;  %v1021_v2 = vor.u32 %v1020_v60, %v3857_v29 }
  0xa9   : > { %v491_v8 = vshrl.u32 %v2945_v62, 16  ;;  %v494_v5 = vshll.u32 %v2945_v62, 16  ;;  %v1197_v16 = vshrl.u32 %v3861_v13, 16  ;;  %v3896_v42 = vcombine.low %v3812_v4, %v3824_v3 }
  0xaa   : > { %1697 = vrot.lane.b32.xlu1 %v3751_v34, %s3200_s9  ;;  %v620_v59 = vrot.slane %v618_v26, 7  ;;  %v499_v25 = vshrl.u32 %v2946_v12, 16  ;;  %v1026_v49 = vrot.slane %v1024_v40, 5  ;;  %v502_v62 = vshll.u32 %v2946_v12, 16 }
  0xab   : > { %v493_v1 = vrot.slane %v491_v8, 7  ;;  %4780 = vst [vmem:[#allocation8_spill] sm:$0xff] %v3896_v42  ;;  %vm1917_vm1 = vcmask 31744   ;;  %vm1966_vm2 = vcmask 64512   ;;  %vm1999_vm3 = vcmask 97280  }
  0xac   : > { %1749 = vrot.lane.b32.xlu0 %v3680_v9, %s3203_s12  ;;  %v3822_v9 = vcombine.low %v1350_v33, %v1353_v47  ;;  %v1007_v33 = vrot.slane %v1005_v23, 4  ;;  %v612_v47 = vrot.slane %v610_v17, 7  ;;  %v623_v58 = vor.u32 %v621_v41, %v620_v59  ;;  %v3127_v41 = vld [vmem:[%s4757_s1 + $0x10] ss:$0 sps:$4 sm:$0x33]  }
  0xad   : > { %v625_v54 = vrot.slane %v620_v59, 4  ;;  %v496_v52 = vor.u32 %v494_v5, %v493_v1  ;;  %v1199_v59 = vrot.slane %v1197_v16, 4  ;;  %v497_v60 = vrot.slane %v493_v1, 4  ;;  %3061 = vmatprep.subr.msk.bf16.mxu0 %vm2250_vm0, %v3127_v41  ;;  %3062 = vmatprep.subr.msk.bf16.mxu1 %vm2250_vm0, %v3127_v41  ;;  %v761_v1 = vld [vmem:[#allocation2 + $0x5c] sm:$0x1] }
  0xae   : > { %1730 = vrot.lane.b32.xlu1 %v3684_v11, %s3202_s11  ;;  %v615_v38 = vor.u32 %v613_v15, %v612_v47  ;;  %v1011_v55 = vor.u32 %v1010_v28, %v1007_v33  ;;  %v2961_v28 = vpack.c.bf16 %v285_v27, %v285_v27  ;;  %v2252_v12 = vsel %vm2250_vm0, %v3127_v41, 0 }
  0xaf   : > { %v811_v26 = vsel %vm3415_vm15, %v625_v54, %v810_v10  ;;  %v3898_v48 = vpop.permute.xlu0 %1675  ;;  %v758_v8 = vsel %vm3372_vm12, %v496_v52, %v757_v37  ;;  %3022 = vmatpush3.bf16.msra.mxu0 %v2252_v12  ;;  %3060 = vmatpush3.bf16.msra.mxu1 %v2252_v12  ;;  %v1356_v37 = vrot.slane %v3824_v3, 5  ;;  %vm2032_vm5 = vcmask 130048  }
  0xb0   : > { %1751 = vrot.lane.b32.xlu0 %v3810_v50, %s3203_s12  ;;  %v807_v19 = vsel %vm3372_vm12, %v615_v38, %v806_v43  ;;  %812 = vst [vmem:[#allocation2 + $0xb0] sm:$0x1] %v811_v26  ;;  %v1012_v33 = vrot.slane %v1011_v55, 4  ;;  %v501_v43 = vrot.slane %v499_v25, 7  ;;  %v1202_v38 = vrot.slane %v1200_v32, 5 }
  0xb1   : > { %808 = vst [vmem:[#allocation2 + $0xa8] sm:$0xf] %v807_v19  ;;  %759 = vst [vmem:[#allocation2 + $0x54] sm:$0xf] %v758_v8  ;;  %v627_v19 = vshrl.u32 %v2961_v28, 16  ;;  %vm2065_vm6 = vcmask 162816  }
  0xb2   : > { %1732 = vrot.lane.b32.xlu1 %v3820_v30, %s3202_s11  ;;  %v1017_v14 = vsel %vm3364_vm9, %v1012_v33, %v3857_v29  ;;  %v506_v5 = vrot.slane %v501_v43, 4  ;;  %v1203_v55 = vor.u32 %v1202_v38, %v1199_v59  ;;  %v1216_v29 = vshll.u32 %v3908_v57, 16 }
  0xb3   : > { %v629_v32 = vrot.slane %v627_v19, 7  ;;  %v1358_v59 = vrot.slane %v1356_v37, 4  ;;  %vm2098_vm7 = vcmask 195584   ;;  %vm2131_vm8 = vcmask 228352  }
  0xb4   : > { %1784 = vrot.lane.b32.xlu0 %v3713_v61, %s3204_s13  ;;  %v616_v61 = vrot.slane %v612_v47, 4  ;;  %v1022_v47 = vrot.slane %v1021_v2, 4  ;;  %v3918_v54 = vpop.permute.xlu0 %1595  ;;  %v762_v27 = vsel %vm3415_vm15, %v506_v5, %v761_v1  ;;  %v1204_v26 = vrot.slane %v1203_v55, 4 }
  0xb5   : > { %763 = vst [vmem:[#allocation2 + $0x5c] sm:$0x1] %v762_v27  ;;  %vm2217_vm11 = vcmask 293888  }
  0xb6   : > { %1765 = vrot.lane.b32.xlu1 %v3708_v18, %s3203_s12  ;;  %v3870_v18 = vld [vmem:[#allocation2 + $0xa0] sm:$0xf]  ;;  %v624_v23 = vsel %vm3383_vm13, %v616_v61, %v623_v58  ;;  %v1027_v40 = vsel %vm3364_vm9, %v1022_v47, %v1026_v49  ;;  %v1218_v49 = vrot.slane %v1216_v29, 5  ;;  %v2807_v47 = vrot.slane %v3812_v4, 9 }
  0xb7   : > { %809 = vst.msk [vmem:[#allocation2 + $0xac] sm:$0xf] %vm709_vm10, %v624_v23  ;;  %v1210_v17 = vshrl.u32 %v3870_v18, 16  ;;  %v1206_v15 = vshll.u32 %v3870_v18, 16  ;;  %v286_v23 = vld [vmem:[%s3291_s7 + $0xe8] sm:$0xff]  ;;  %v3927_v16 = vcombine.low %v1017_v14, %v1027_v40  ;;  %v287_v40 = vld [vmem:[%s3291_s7 + $0xf0] sm:$0xff] }
  0xb8   : > { %1786 = vrot.lane.b32.xlu0 %v3822_v9, %s3204_s13  ;;  %v2962_v25 = vpack.c.bf16 %v286_v23, %v286_v23  ;;  %v1357_v5 = vsel %vm3350_vm4, %v2807_v47, %v1356_v37  ;;  %v1412_v29 = vrot.slane %v3870_v18, 5  ;;  %v4032_v36 = vld [vmem:[#allocation2 + $0xa8] sm:$0xf] }
  0xb9   : > { %v3904_v61 = vrot.slane %v1206_v15, 5  ;;  %v1212_v58 = vrot.slane %v1210_v17, 4  ;;  %v630_v17 = vshll.u32 %v2961_v28, 16  ;;  %v3936_v15 = vcombine.low %v3861_v13, %v3870_v18 }
  0xba   : > { %1767 = vrot.lane.b32.xlu1 %v3853_v45, %s3203_s12  ;;  %v1359_v28 = vrot.slane %v3855_v53, 5  ;;  %v638_v38 = vshll.u32 %v2962_v25, 16  ;;  %v1414_v18 = vrot.slane %v1412_v29, 4 }
  0xbb   : > { %v1213_v2 = vor.u32 %v1212_v58, %v3904_v61  ;;  %4781 = vst [vmem:[#allocation9_spill] sm:$0xff] %v3936_v15  ;;  %v632_v52 = vor.u32 %v630_v17, %v629_v32  ;;  %v1209_v58 = vsel %vm3364_vm9, %v1204_v26, %v3904_v61  ;;  %v288_v61 = vld [vmem:[%s3291_s7 + $0xf8] sm:$0xff] }
  0xbc   : > { %1819 = vrot.lane.b32.xlu0 %v3785_v21, %s3205_s14  ;;  %v1360_v23 = vsel %vm3350_vm4, %v1358_v59, %v1359_v28  ;;  %v2964_v27 = vpack.c.bf16 %v288_v61, %v288_v61  ;;  %v3991_v28 = vld [vmem:[#allocation2 + $0x48] sm:$0xf] }
  0xbd   : > { %v1214_v41 = vrot.slane %v1213_v2, 4  ;;  %v3979_v37 = vcombine.low %v1357_v5, %v1360_v23 }
  0xbe   : > { %1800 = vrot.lane.b32.xlu1 %v3751_v34, %s3204_s13  ;;  %v504_v34 = vor.u32 %v502_v62, %v501_v43  ;;  %v635_v62 = vshrl.u32 %v2962_v25, 16  ;;  %v633_v43 = vrot.slane %v629_v32, 4  ;;  %v2963_v25 = vpack.c.bf16 %v287_v40, %v287_v40 }
  0xbf   : > { %v3942_v33 = vpop.permute.xlu1 %1726  ;;  %v1219_v12 = vsel %vm3364_vm9, %v1214_v41, %v1218_v49  ;;  %v652_v26 = vshrl.u32 %v2964_v27, 16  ;;  %v655_v41 = vshll.u32 %v2964_v27, 16  ;;  %v2815_v49 = vrot.slane %v3861_v13, 9 }
  0xc0   : > { %1821 = vrot.lane.b32.xlu0 %v3896_v42, %s3205_s14  ;;  %v505_v10 = vsel %vm3383_vm13, %v497_v60, %v504_v34  ;;  %v813_v60 = vld [vmem:[#allocation2 + $0xb4] sm:$0xf]  ;;  %v637_v8 = vrot.slane %v635_v62, 7  ;;  %v817_v34 = vld [vmem:[#allocation2 + $0xbc] sm:$0x1]  ;;  %v3965_v19 = vcombine.low %v1209_v58, %v1219_v12  ;;  %v644_v32 = vshrl.u32 %v2963_v25, 16 }
  0xc1   : > { %760 = vst.msk [vmem:[#allocation2 + $0x58] sm:$0xf] %vm709_vm10, %v505_v10  ;;  %v814_v53 = vsel %vm3372_vm12, %v632_v52, %v813_v60  ;;  %v647_v17 = vshll.u32 %v2963_v25, 16  ;;  %v1415_v52 = vrot.slane %v3908_v57, 5  ;;  %v654_v47 = vrot.slane %v652_v26, 7 }
  0xc2   : > { %1802 = vrot.lane.b32.xlu1 %v3881_v63, %s3204_s13  ;;  %v640_v4 = vor.u32 %v638_v38, %v637_v8  ;;  %v642_v14 = vrot.slane %v637_v8, 4  ;;  %815 = vst [vmem:[#allocation2 + $0xb4] sm:$0xf] %v814_v53  ;;  %v646_v62 = vrot.slane %v644_v32, 7  ;;  %v3995_v60 = vld [vmem:[#allocation2 + $0x4c] sm:$0xf]  ;;  %v1413_v38 = vsel %vm3350_vm4, %v2815_v49, %v1412_v29 }
  0xc3   : > { %v657_v8 = vor.u32 %v655_v41, %v654_v47  ;;  %v820_v57 = vld [vmem:[#allocation2 + $0xc0] sm:$0xf]  ;;  %v1416_v58 = vsel %vm3350_vm4, %v1414_v18, %v1415_v52  ;;  %v659_v12 = vrot.slane %v654_v47, 4  ;;  %v824_v53 = vld [vmem:[#allocation2 + $0xc8] sm:$0x1]  ;;  %v1042_v40 = vshrl.u32 %v3995_v60, 16 }
  0xc4   : > { %1854 = vrot.lane.b32.xlu0 %v3810_v50, %s3206_s29  ;;  %v3940_v3 = vpop.permute.xlu0 %1710  ;;  %v641_v1 = vsel %vm3383_vm13, %v633_v43, %v640_v4  ;;  %v818_v55 = vsel %vm3415_vm15, %v642_v14, %v817_v34  ;;  %v649_v13 = vor.u32 %v647_v17, %v646_v62  ;;  %v650_v43 = vrot.slane %v646_v62, 4  ;;  %v847_v17 = vld [vmem:[#allocation2 + $0x50] sm:$0x1]  ;;  %v4034_v26 = vld [vmem:[#allocation2 + $0xac] sm:$0xf] }
  0xc5   : > { %816 = vst.msk [vmem:[#allocation2 + $0xb8] sm:$0xf] %vm709_vm10, %v641_v1  ;;  %819 = vst [vmem:[#allocation2 + $0xbc] sm:$0x1] %v818_v55  ;;  %v1029_v34 = vshrl.u32 %v3991_v28, 16  ;;  %v1032_v4 = vshll.u32 %v3991_v28, 16  ;;  %v4017_v55 = vcombine.low %v1413_v38, %v1416_v58  ;;  %v825_v29 = vsel %vm3415_vm15, %v659_v12, %v824_v53 }
  0xc6   : > { %1835 = vrot.lane.b32.xlu1 %v3820_v30, %s3205_s14  ;;  %v1038_v5 = vshll.u32 %v3995_v60, 16  ;;  %v658_v23 = vsel %vm3383_vm13, %v650_v43, %v657_v8  ;;  %v821_v61 = vsel %vm3372_vm12, %v649_v13, %v820_v57  ;;  %826 = vst [vmem:[#allocation2 + $0xc8] sm:$0x1] %v825_v29  ;;  %v1048_v18 = vshll.u32 %v847_v17, 16 }
  0xc7   : > { %v3973_v2 = vpop.permute.xlu1 %1728  ;;  %822 = vst [vmem:[#allocation2 + $0xc0] sm:$0xf] %v821_v61  ;;  %823 = vst.msk [vmem:[#allocation2 + $0xc4] sm:$0xf] %vm709_vm10, %v658_v23  ;;  %v1031_v39 = vrot.slane %v1029_v34, 4  ;;  %v1034_v25 = vrot.slane %v1032_v4, 5  ;;  %v4050_v8 = vcombine.low %v3991_v28, %v3995_v60 }
  0xc8   : > { %1856 = vrot.lane.b32.xlu0 %v3927_v16, %s3206_s29  ;;  %v1040_v27 = vrot.slane %v1038_v5, 5  ;;  %v1221_v62 = vshrl.u32 %v4032_v36, 16  ;;  %v1224_v47 = vshll.u32 %v4032_v36, 16  ;;  %v1234_v13 = vshrl.u32 %v4034_v26, 16  ;;  %v4060_v23 = vld [vmem:[#allocation2 + $0xb0] sm:$0x1] }
  0xc9   : > { %v1035_v41 = vor.u32 %v1034_v25, %v1031_v39  ;;  %v1230_v43 = vshll.u32 %v4034_v26, 16  ;;  %4782 = vst [vmem:[#allocation10_spill] sm:$0xff] %v4050_v8  ;;  %v1050_v58 = vrot.slane %v1048_v18, 5  ;;  %v2808_v18 = vrot.slane %v3991_v28, 9 }
  0xca   : > { %1837 = vrot.lane.b32.xlu1 %v3936_v15, %s3205_s14  ;;  %v3967_v10 = vpop.permute.xlu0 %1712  ;;  %v1223_v4 = vrot.slane %v1221_v62, 4  ;;  %v1226_v53 = vrot.slane %v1224_v47, 5  ;;  %v1236_v5 = vrot.slane %v1234_v13, 4  ;;  %v4079_v47 = vld [vmem:[#allocation2 + $0x54] sm:$0xf]  ;;  %vm2164_vm10 = vcmask 261120  }
  0xcb   : > { %v1036_v57 = vrot.slane %v1035_v41, 4  ;;  %v1240_v41 = vshll.u32 %v4060_v23, 16  ;;  %v3131_v13 = vld [vmem:[#allocation2] sm:$0xf] }
  0xcc   : > { %1889 = vrot.lane.b32.xlu0 %v3822_v9, %s3207_s30  ;;  %v1227_v25 = vor.u32 %v1226_v53, %v1223_v4 }
  0xcd   : > { %v1041_v61 = vsel %vm3364_vm9, %v1036_v57, %v1040_v27 }
  0xce   : > { %1870 = vrot.lane.b32.xlu1 %v3853_v45, %s3206_s29  ;;  %v1228_v28 = vrot.slane %v1227_v25, 4 }
  0xd0   : > { %1603 = vrot.lane.b32.xlu0 %v3810_v50, %s3201_s10  ;;  %v3987_v50 = vpop.permute.xlu0 %1677 }
  0xd2   : > { %1872 = vrot.lane.b32.xlu1 %v3965_v19, %s3206_s29 }
  0xd4   : > { %1891 = vrot.lane.b32.xlu0 %v3979_v37, %s3207_s30 }
  0xd5   : > { %v3989_v59 = vpop.permute.xlu1 %1691 }
  0xd6   : > { %1905 = vrot.lane.b32.xlu1 %v3881_v63, %s3207_s30 }
  0xd8   : > { %1605 = vrot.lane.b32.xlu0 %v3927_v16, %s3201_s10 }
  0xd9   : > { %v4005_v14 = vpop.permute.xlu1 %1693 }
  0xda   : > { %1619 = vrot.lane.b32.xlu1 %v3853_v45, %s3201_s10  ;;  %v4015_v1 = vpop.permute.xlu0 %1611  ;;  %v1044_v45 = vrot.slane %v1042_v40, 4  ;;  %v1232_v40 = vrot.slane %v1230_v43, 5  ;;  %v3132_v43 = vld [vmem:[#allocation2 + $0x4] sm:$0xf] }
  0xdb   : > { %v2820_v57 = vcombine.low %v3131_v13, %v3132_v43 }
  0xdc   : > { %1683 = vrot.lane.b32.xlu0 %v3822_v9, %s3200_s9  ;;  %v1045_v49 = vor.u32 %v1044_v45, %v1040_v27  ;;  %v1237_v45 = vor.u32 %v1236_v5, %v1232_v40  ;;  %v1053_v5 = vshrl.u32 %v4079_v47, 16 }
  0xdd   : > { %v4024_v46 = vpop.permute.xlu1 %1597 }
  0xde   : > { %1907 = vrot.lane.b32.xlu1 %v4017_v55, %s3207_s30  ;;  %v4028_v32 = vpop.permute.xlu0 %1745  ;;  %v1046_v38 = vrot.slane %v1045_v49, 4  ;;  %v1238_v4 = vrot.slane %v1237_v45, 4  ;;  %v1920_v45 = vsel %vm1917_vm1, %v2820_v57, %v3918_v54 }
  0xdf   : > { %v1968_v30 = vsel %vm1966_vm2, %v1920_v45, %v3898_v48 }
  0xe0   : > { %1685 = vrot.lane.b32.xlu0 %v3979_v37, %s3200_s9  ;;  %v1051_v29 = vsel %vm3364_vm9, %v1046_v38, %v1050_v58  ;;  %v4087_v58 = vcombine.low %v4032_v36, %v4034_v26 }
  0xe1   : > { %v4036_v9 = vpop.permute.xlu1 %1613  ;;  %v4076_v27 = vcombine.low %v1041_v61, %v1051_v29  ;;  %v1056_v61 = vshll.u32 %v4079_v47, 16 }
  0xe2   : > { %1621 = vrot.lane.b32.xlu1 %v3965_v19, %s3201_s10  ;;  %v4040_v52 = vpop.permute.xlu0 %1747 }
  0xe3   : > { %v1058_v57 = vrot.slane %v1056_v61, 5  ;;  %v3133_v61 = vld [vmem:[#allocation2 + $0x60] sm:$0xf] }
  0xe4   : > { %1718 = vrot.lane.b32.xlu0 %v3896_v42, %s3202_s11 }
  0xe5   : > { %v4056_v34 = vpop.permute.xlu1 %1761 }
  0xe6   : > { %1699 = vrot.lane.b32.xlu1 %v3881_v63, %s3200_s9  ;;  %v4054_v12 = vpop.permute.xlu0 %1780  ;;  %v1363_v63 = vrot.slane %v3995_v60, 5  ;;  %v1366_v60 = vrot.slane %v847_v17, 5  ;;  %v1242_v17 = vrot.slane %v1240_v41, 5 }
  0xe8   : > { %1720 = vrot.lane.b32.xlu0 %v4050_v8, %s3202_s11  ;;  %v1365_v62 = vrot.slane %v1363_v63, 4  ;;  %v1364_v29 = vsel %vm3350_vm4, %v2808_v18, %v1363_v63  ;;  %v1233_v63 = vsel %vm3364_vm9, %v1228_v28, %v1232_v40  ;;  %v1243_v18 = vsel %vm3364_vm9, %v1238_v4, %v1242_v17 }
  0xe9   : > { %v4126_v28 = vcombine.low %v1233_v63, %v1243_v18  ;;  %v2816_v4 = vrot.slane %v4032_v36, 9  ;;  %v1422_v17 = vrot.slane %v4060_v23, 5  ;;  %v2001_v23 = vsel %vm1999_vm3, %v1968_v30, %v3940_v3 }
  0xea   : > { %1701 = vrot.lane.b32.xlu1 %v4017_v55, %s3200_s9  ;;  %v4069_v39 = vpop.permute.xlu0 %1782  ;;  %v1367_v13 = vsel %vm3350_vm4, %v1365_v62, %v1366_v60  ;;  %v1055_v60 = vrot.slane %v1053_v5, 4  ;;  %v4130_v5 = vld [vmem:[#allocation2 + $0x5c] sm:$0x1]  ;;  %v1923_v63 = vsel %vm1917_vm1, %v3447_v7, %v4024_v46 }
  0xeb   : > { %v4118_v54 = vcombine.low %v1364_v29, %v1367_v13  ;;  %v3134_v29 = vld [vmem:[#allocation2 + $0x64] sm:$0xf]  ;;  %v4134_v13 = vld [vmem:[#allocation2 + $0xb4] sm:$0xf]  ;;  %v1072_v45 = vshll.u32 %v4130_v5, 16 }
  0xec   : > { %v4072_v49 = vpop.permute.xlu1 %1763  ;;  %1753 = vrot.lane.b32.xlu0 %v3927_v16, %s3203_s12  ;;  %v4089_v16 = vld [vmem:[#allocation2 + $0x58] sm:$0xf]  ;;  %v4132_v48 = vcombine.low %v3133_v61, %v3134_v29  ;;  %v1059_v36 = vor.u32 %v1058_v57, %v1055_v60  ;;  %v1245_v30 = vshrl.u32 %v4134_v13, 16  ;;  %v1248_v3 = vshll.u32 %v4134_v13, 16 }
  0xed   : > { %v1066_v43 = vshrl.u32 %v4089_v16, 16  ;;  %v1062_v25 = vshll.u32 %v4089_v16, 16 }
  0xee   : > { %1734 = vrot.lane.b32.xlu1 %v3936_v15, %s3202_s11  ;;  %v4083_v38 = vpop.permute.xlu0 %1815  ;;  %v1419_v15 = vrot.slane %v4034_v26, 5 }
  0xef   : > { %v4122_v26 = vrot.slane %v1062_v25, 5  ;;  %v1068_v42 = vrot.slane %v1066_v43, 4  ;;  %v4140_v43 = vld [vmem:[#allocation2 + $0xb8] sm:$0xf] }
  0xf0   : > { %v4091_v53 = vpop.permute.xlu1 %1796  ;;  %1755 = vrot.lane.b32.xlu0 %v4076_v27, %s3203_s12  ;;  %v1420_v60 = vsel %vm3350_vm4, %v2816_v4, %v1419_v15  ;;  %v1258_v61 = vshrl.u32 %v4140_v43, 16  ;;  %v1254_v7 = vshll.u32 %v4140_v43, 16  ;;  %v1970_v4 = vsel %vm1966_vm2, %v1923_v63, %v3987_v50  ;;  %v4184_v63 = vld [vmem:[#allocation2 + $0xbc] sm:$0x1] }
  0xf1   : > { %v1069_v25 = vor.u32 %v1068_v42, %v4122_v26  ;;  %v2034_v42 = vsel %vm2032_vm5, %v2001_v23, %v4028_v32  ;;  %v1060_v32 = vrot.slane %v1059_v36, 4  ;;  %v1074_v23 = vrot.slane %v1072_v45, 5 }
  0xf2   : > { %1736 = vrot.lane.b32.xlu1 %v4087_v58, %s3202_s11  ;;  %v4107_v41 = vpop.permute.xlu0 %1817  ;;  %v2067_v46 = vsel %vm2065_vm6, %v2034_v42, %v4054_v12  ;;  %v1944_v12 = vsel %vm1917_vm1, %v4132_v48, %v4015_v1  ;;  %v1247_v36 = vrot.slane %v1245_v30, 4  ;;  %v1260_v45 = vrot.slane %v1258_v61, 4 }
  0xf4   : > { %v4114_v62 = vpop.permute.xlu1 %1798  ;;  %1788 = vrot.lane.b32.xlu0 %v3979_v37, %s3204_s13  ;;  %v1421_v37 = vrot.slane %v1419_v15, 4  ;;  %v4169_v15 = vcombine.low %v4079_v47, %v4089_v16 }
  0xf6   : > { %1769 = vrot.lane.b32.xlu1 %v3965_v19, %s3203_s12  ;;  %v1851_v40 = vpop.permute.xlu0 %1850  ;;  %v1423_v57 = vsel %vm3350_vm4, %v1421_v37, %v1422_v17  ;;  %v2100_v37 = vsel %vm2098_vm7, %v2067_v46, %v4083_v38  ;;  %v1070_v17 = vrot.slane %v1069_v25, 4  ;;  %v1250_v38 = vrot.slane %v1248_v3, 5 }
  0xf7   : > { %v2133_v42 = vsel %vm2131_vm8, %v2100_v37, %v1851_v40  ;;  %v4181_v21 = vcombine.low %v1420_v60, %v1423_v57  ;;  %v1256_v25 = vrot.slane %v1254_v7, 5  ;;  %v2003_v46 = vsel %vm1999_vm3, %v1970_v4, %v3967_v10 }
  0xf8   : > { %v4136_v19 = vpop.permute.xlu1 %1831  ;;  %1790 = vrot.lane.b32.xlu0 %v4118_v54, %s3204_s13  ;;  %v1075_v40 = vsel %vm3364_vm9, %v1070_v17, %v1074_v23  ;;  %v1264_v60 = vshll.u32 %v4184_v63, 16  ;;  %v2036_v57 = vsel %vm2032_vm5, %v2003_v46, %v4040_v52  ;;  %v1251_v30 = vor.u32 %v1250_v38, %v1247_v36 }
  0xf9   : > { %v1261_v3 = vor.u32 %v1260_v45, %v1256_v25  ;;  %v4219_v4 = vcombine.low %v4134_v13, %v4140_v43  ;;  %v1373_v38 = vrot.slane %v4130_v5, 5 }
  0xfa   : > { %1771 = vrot.lane.b32.xlu1 %v4126_v28, %s3203_s12  ;;  %v1853_v18 = vpop.permute.xlu0 %1852 }
  0xfc   : > { %v4163_v29 = vpop.permute.xlu1 %1833  ;;  %1823 = vrot.lane.b32.xlu0 %v4050_v8, %s3205_s14 }
  0xfe   : > { %1804 = vrot.lane.b32.xlu1 %v4017_v55, %s3204_s13  ;;  %v1886_v8 = vpop.permute.xlu0 %1885  ;;  %v1984_v55 = vsel %vm1966_vm2, %v1944_v12, %v3989_v59 }
  0xff   : > { %v2166_v50 = vsel %vm2164_vm10, %v2133_v42, %v1886_v8  ;;  %v1065_v8 = vsel %vm3364_vm9, %v1060_v32, %v4122_v26  ;;  %v2017_v59 = vsel %vm1999_vm3, %v1984_v55, %v3942_v33  ;;  %v2069_v26 = vsel %vm2065_vm6, %v2036_v57, %v4069_v39 }
 0x100   : > { %v1867_v1 = vpop.permute.xlu1 %1866  ;;  %1825 = vrot.lane.b32.xlu0 %v4169_v15, %s3205_s14  ;;  %3023 = vmatprep.mubr.msk.bf16.mxu0 %vm2217_vm11, %v2166_v50  ;;  %v4211_v7 = vcombine.low %v1065_v8, %v1075_v40  ;;  %v2050_v32 = vsel %vm2032_vm5, %v2017_v59, %v4056_v34  ;;  %v2102_v52 = vsel %vm2098_vm7, %v2069_v26, %v4107_v41  ;;  %v1370_v33 = vrot.slane %v4089_v16, 5 }
 0x101   : > { %v1947_v39 = vsel %vm1917_vm1, %v3427_v44, %v4036_v9  ;;  %v2083_v37 = vsel %vm2065_vm6, %v2050_v32, %v4091_v53  ;;  %v2135_v17 = vsel %vm2131_vm8, %v2102_v52, %v1853_v18  ;;  %v1266_v41 = vrot.slane %v1264_v60, 5 }
 0x102   : > { %1806 = vrot.lane.b32.xlu1 %v4181_v21, %s3204_s13  ;;  %v4200_v10 = vpop.permute.xlu0 %1599  ;;  %v2116_v23 = vsel %vm2098_vm7, %v2083_v37, %v4136_v19  ;;  %v1252_v16 = vrot.slane %v1251_v30, 4  ;;  %v1262_v42 = vrot.slane %v1261_v3, 4  ;;  %v2809_v53 = vrot.slane %v4079_v47, 9 }
 0x103   : > { %v2149_v36 = vsel %vm2131_vm8, %v2116_v23, %v1867_v1  ;;  %v1986_v18 = vsel %vm1966_vm2, %v1947_v39, %v4005_v14  ;;  %v1372_v19 = vrot.slane %v1370_v33, 4  ;;  %v1429_v26 = vrot.slane %v4184_v63, 5 }
 0x104   : > { %v1869_v61 = vpop.permute.xlu1 %1868  ;;  %1858 = vrot.lane.b32.xlu0 %v4076_v27, %s3206_s29  ;;  %v1257_v46 = vsel %vm3364_vm9, %v1252_v16, %v1256_v25  ;;  %v1267_v47 = vsel %vm3364_vm9, %v1262_v42, %v1266_v41  ;;  %v2019_v14 = vsel %vm1999_vm3, %v1986_v18, %v3973_v2  ;;  %v1371_v55 = vsel %vm3350_vm4, %v2809_v53, %v1370_v33 }
 0x105   : > { %v2052_v5 = vsel %vm2032_vm5, %v2019_v14, %v4072_v49  ;;  %v1374_v25 = vsel %vm3350_vm4, %v1372_v19, %v1373_v38  ;;  %v4269_v40 = vcombine.low %v1257_v46, %v1267_v47  ;;  %v1426_v49 = vrot.slane %v4140_v43, 5  ;;  %v877_v38 = vld [vmem:[#allocation2 + $0xc8] sm:$0x1] }
 0x106   : > { %1839 = vrot.lane.b32.xlu1 %v4087_v58, %s3205_s14  ;;  %v1888_v34 = vpop.permute.xlu0 %1887  ;;  %v2085_v8 = vsel %vm2065_vm6, %v2052_v5, %v4114_v62  ;;  %v4277_v3 = vcombine.low %v1371_v55, %v1374_v25  ;;  %v1451_v5 = vshll.u32 %v877_v38, 16 }
 0x107   : > { %v2168_v12 = vsel %vm2164_vm10, %v2135_v17, %v1888_v34  ;;  %v2118_v60 = vsel %vm2098_vm7, %v2085_v8, %v4163_v29  ;;  %v2817_v29 = vrot.slane %v4134_v13, 9  ;;  %v1428_v43 = vrot.slane %v1426_v49, 4  ;;  %v876_v34 = vld [vmem:[#allocation2 + $0xc4] sm:$0xf] }
 0x108   : > { %v1902_v9 = vpop.permute.xlu1 %1901  ;;  %1860 = vrot.lane.b32.xlu0 %v4211_v7, %s3206_s29  ;;  %3024 = vmatmul.mubr.msk.bf16.vlgmr.msra.gmra.mrb[0].mxu0 %vm2217_vm11, %v2168_v12  ;;  %v2151_v57 = vsel %vm2131_vm8, %v2118_v60, %v1869_v61  ;;  %v1441_v16 = vshll.u32 %v876_v34, 16 }
 0x109   : > { %v2182_v50 = vsel %vm2164_vm10, %v2149_v36, %v1902_v9  ;;  %v1427_v32 = vsel %vm3350_vm4, %v2817_v29, %v1426_v49  ;;  %v1430_v52 = vsel %vm3350_vm4, %v1428_v43, %v1429_v26  ;;  %v1453_v49 = vrot.slane %v1451_v5, 5 }
 0x10a   : > { %1841 = vrot.lane.b32.xlu1 %v4219_v4, %s3205_s14  ;;  %3039 = vmatprep.mubr.msk.bf16.mxu1 %vm2217_vm11, %v2182_v50  ;;  %v4245_v45 = vpop.permute.xlu0 %1601  ;;  %v4307_v33 = vcombine.low %v1427_v32, %v1430_v52  ;;  %v1443_v18 = vrot.slane %v1441_v16, 5  ;;  %v1460_v29 = vrot.slane %v876_v34, 5  ;;  %v4365_v52 = vld [vmem:[#allocation2 + $0xcc] sm:$0xf]  ;;  %v4367_v16 = vld [vmem:[#allocation2 + $0xd0] sm:$0xf] }
 0x10c   : > { %v4253_v1 = vpop.permute.xlu1 %1615  ;;  %1893 = vrot.lane.b32.xlu0 %v4118_v54, %s3207_s30 }
 0x10e   : > { %1874 = vrot.lane.b32.xlu1 %v4126_v28, %s3206_s29  ;;  %v4267_v2 = vpop.permute.xlu0 %1679 }
 0x110   : > { %v1904_v30 = vpop.permute.xlu1 %1903  ;;  %1607 = vrot.lane.b32.xlu0 %v4076_v27, %s3201_s10 }
 0x111   : > { %v2184_v62 = vsel %vm2164_vm10, %v2151_v57, %v1904_v30 }
 0x112   : > { %1876 = vrot.lane.b32.xlu1 %v4269_v40, %s3206_s29  ;;  %3040 = vmatmul.mubr.msk.bf16.vlgmr.msra.gmra.mrb[0].mxu1 %vm2217_vm11, %v2184_v62  ;;  %v4283_v59 = vpop.permute.xlu0 %1681 }
 0x114   : > { %v4287_v61 = vpop.permute.xlu1 %1617  ;;  %1895 = vrot.lane.b32.xlu0 %v4277_v3, %s3207_s30 }
 0x116   : > { %1909 = vrot.lane.b32.xlu1 %v4181_v21, %s3207_s30  ;;  %v4293_v27 = vpop.permute.xlu0 %1714 }
 0x118   : > { %v4299_v13 = vpop.permute.xlu1 %1695  ;;  %1609 = vrot.lane.b32.xlu0 %v4211_v7, %s3201_s10 }
 0x11a   : > { %1623 = vrot.lane.b32.xlu1 %v4126_v28, %s3201_s10  ;;  %v4305_v63 = vpop.permute.xlu0 %1716  ;;  %v875_v28 = vld [vmem:[#allocation2 + $0xc0] sm:$0xf] }
 0x11b   : > { %v1432_v23 = vshrl.u32 %v875_v28, 16  ;;  %v1435_v12 = vshll.u32 %v875_v28, 16  ;;  %v4345_v25 = vcombine.low %v875_v28, %v876_v34 }
 0x11c   : > { %v4309_v39 = vpop.permute.xlu1 %1697  ;;  %1687 = vrot.lane.b32.xlu0 %v4118_v54, %s3200_s9  ;;  %v1445_v54 = vshrl.u32 %v876_v34, 16  ;;  %v1926_v34 = vsel %vm1917_vm1, %v3484_v35, %v4200_v10  ;;  %v1479_v35 = vshrl.u32 %v4367_v16, 16 }
 0x11d   : > { %v1434_v9 = vrot.slane %v1432_v23, 4  ;;  %v1437_v53 = vrot.slane %v1435_v12, 5  ;;  %v2818_v23 = vrot.slane %v875_v28, 9  ;;  %v1462_v12 = vrot.slane %v1460_v29, 4 }
 0x11e   : > { %1911 = vrot.lane.b32.xlu1 %v4307_v33, %s3207_s30  ;;  %v4315_v37 = vpop.permute.xlu0 %1749  ;;  %v1447_v50 = vrot.slane %v1445_v54, 4  ;;  %v1463_v54 = vrot.slane %v877_v38, 5  ;;  %v1475_v38 = vshll.u32 %v4367_v16, 16 }
 0x11f   : > { %v1438_v47 = vor.u32 %v1437_v53, %v1434_v9 }
 0x120   : > { %v4317_v17 = vpop.permute.xlu1 %1730  ;;  %1689 = vrot.lane.b32.xlu0 %v4277_v3, %s3200_s9  ;;  %v1448_v14 = vor.u32 %v1447_v50, %v1443_v18  ;;  %v1461_v50 = vsel %vm3350_vm4, %v2818_v23, %v1460_v29 }
 0x121   : > { %v1439_v8 = vrot.slane %v1438_v47, 4 }
 0x122   : > { %1625 = vrot.lane.b32.xlu1 %v4269_v40, %s3201_s10  ;;  %v4323_v41 = vpop.permute.xlu0 %1751  ;;  %v1449_v60 = vrot.slane %v1448_v14, 4 }
 0x124   : > { %v4325_v42 = vpop.permute.xlu1 %1732  ;;  %1722 = vrot.lane.b32.xlu0 %v4169_v15, %s3202_s11  ;;  %v1454_v62 = vsel %vm3364_vm9, %v1449_v60, %v1453_v49 }
 0x126   : > { %1703 = vrot.lane.b32.xlu1 %v4181_v21, %s3200_s9  ;;  %v1785_v36 = vpop.permute.xlu0 %1784 }
 0x128   : > { %v4331_v19 = vpop.permute.xlu1 %1765  ;;  %1724 = vrot.lane.b32.xlu0 %v4132_v48, %s3202_s11 }
 0x12a   : > { %1705 = vrot.lane.b32.xlu1 %v4307_v33, %s3200_s9  ;;  %v4337_v46 = vpop.permute.xlu0 %1786 }
 0x12c   : > { %v4339_v21 = vpop.permute.xlu1 %1767  ;;  %1757 = vrot.lane.b32.xlu0 %v4211_v7, %s3203_s12  ;;  %v1444_v7 = vsel %vm3364_vm9, %v1439_v8, %v1443_v18  ;;  %v1469_v18 = vshll.u32 %v4365_v52, 16 }
 0x12d   : > { %v4363_v32 = vcombine.low %v1444_v7, %v1454_v62  ;;  %v1477_v62 = vrot.slane %v1475_v38, 5 }
 0x12e   : > { %1738 = vrot.lane.b32.xlu1 %v4219_v4, %s3202_s11  ;;  %v1820_v55 = vpop.permute.xlu0 %1819 }
 0x130   : > { %v4347_v57 = vpop.permute.xlu1 %1800  ;;  %1759 = vrot.lane.b32.xlu0 %v3530_v0, %s3203_s12 }
 0x132   : > { %1740 = vrot.lane.b32.xlu1 %v4345_v25, %s3202_s11  ;;  %v1822_v30 = vpop.permute.xlu0 %1821 }
 0x134   : > { %v4357_v43 = vpop.permute.xlu1 %1802  ;;  %1792 = vrot.lane.b32.xlu0 %v4277_v3, %s3204_s13  ;;  %v1466_v3 = vshrl.u32 %v4365_v52, 16 }
 0x136   : > { %1773 = vrot.lane.b32.xlu1 %v4269_v40, %s3203_s12  ;;  %v1855_v26 = vpop.permute.xlu0 %1854  ;;  %v1972_v40 = vsel %vm1966_vm2, %v1926_v34, %v4267_v2  ;;  %v1464_v2 = vsel %vm3350_vm4, %v1462_v12, %v1463_v54  ;;  %v1468_v5 = vrot.slane %v1466_v3, 4 }
 0x137   : > { %v2005_v28 = vsel %vm1999_vm3, %v1972_v40, %v4293_v27  ;;  %v4402_v49 = vcombine.low %v1461_v50, %v1464_v2  ;;  %v1494_v50 = vrot.slane %v4367_v16, 5 }
 0x138   : > { %v1836_v9 = vpop.permute.xlu1 %1835  ;;  %1794 = vrot.lane.b32.xlu0 %v3512_v51, %s3204_s13  ;;  %v2038_v10 = vsel %vm2032_vm5, %v2005_v28, %v4315_v37  ;;  %v1929_v37 = vsel %vm1917_vm1, %v3639_v20, %v4245_v45  ;;  %v880_v20 = vld [vmem:[#allocation2 + $0xd4] sm:$0x1] }
 0x139   : > { %v2071_v27 = vsel %vm2065_vm6, %v2038_v10, %v1785_v36  ;;  %v1471_v36 = vrot.slane %v1469_v18, 5  ;;  %v1974_v45 = vsel %vm1966_vm2, %v1929_v37, %v4283_v59  ;;  %v1485_v54 = vshll.u32 %v880_v20, 16 }
 0x13a   : > { %1775 = vrot.lane.b32.xlu1 %v4363_v32, %s3203_s12  ;;  %v1857_v53 = vpop.permute.xlu0 %1856  ;;  %v2104_v14 = vsel %vm2098_vm7, %v2071_v27, %v1820_v55  ;;  %v2007_v55 = vsel %vm1999_vm3, %v1974_v45, %v4305_v63  ;;  %v1496_v27 = vrot.slane %v1494_v50, 4 }
 0x13b   : > { %v2137_v8 = vsel %vm2131_vm8, %v2104_v14, %v1855_v26  ;;  %v1472_v23 = vor.u32 %v1471_v36, %v1468_v5  ;;  %v2040_v12 = vsel %vm2032_vm5, %v2007_v55, %v4323_v41  ;;  %v1487_v18 = vrot.slane %v1485_v54, 5 }
 0x13c   : > { %v4391_v47 = vpop.permute.xlu1 %1837  ;;  %1827 = vrot.lane.b32.xlu0 %v4132_v48, %s3205_s14  ;;  %v1481_v48 = vrot.slane %v1479_v35, 4  ;;  %v1497_v14 = vrot.slane %v880_v20, 5 }
 0x13d   : > { %v1473_v3 = vrot.slane %v1472_v23, 4 }
 0x13e   : > { %1808 = vrot.lane.b32.xlu1 %v4307_v33, %s3204_s13  ;;  %v1890_v60 = vpop.permute.xlu0 %1889  ;;  %v1950_v33 = vsel %vm1917_vm1, %v3468_v24, %v4253_v1  ;;  %v1482_v59 = vor.u32 %v1481_v48, %v1477_v62  ;;  %v2073_v1 = vsel %vm2065_vm6, %v2040_v12, %v4337_v46  ;;  %v2871_v46 = vcombine.low %v4365_v52, %v4367_v16 }
 0x13f   : > { %v2170_v7 = vsel %vm2164_vm10, %v2137_v8, %v1890_v60  ;;  %v1478_v10 = vsel %vm3364_vm9, %v1473_v3, %v1477_v62 }
 0x140   : > { %v1871_v29 = vpop.permute.xlu1 %1870  ;;  %1829 = vrot.lane.b32.xlu0 %v3427_v44, %s3205_s14  ;;  %3027 = vmatprep.mubr.msk.bf16.mxu0 %vm2217_vm11, %v2170_v7  ;;  %v1988_v44 = vsel %vm1966_vm2, %v1950_v33, %v4299_v13  ;;  %v2106_v13 = vsel %vm2098_vm7, %v2073_v1, %v1822_v30 }
 0x141   : > { %v2021_v24 = vsel %vm1999_vm3, %v1988_v44, %v4317_v17  ;;  %v2139_v40 = vsel %vm2131_vm8, %v2106_v13, %v1857_v53 }
 0x142   : > { %1810 = vrot.lane.b32.xlu1 %v4402_v49, %s3204_s13  ;;  %v4417_v26 = vpop.permute.xlu0 %1603  ;;  %v2054_v34 = vsel %vm2032_vm5, %v2021_v24, %v4331_v19  ;;  %v1483_v19 = vrot.slane %v1482_v59, 4  ;;  %v4783_v59 = vld [vmem:[#allocation6_spill] sm:$0xff]  ;;  %s2997_s13 = sshll.u32 %s3256_s19, 11  ;;  %s4714_s19 = scalar_lea.sflag [#allocation4], %s188_s27 }
 0x143   : > { %v2087_v41 = vsel %vm2065_vm6, %v2054_v34, %v4347_v57  ;;  %v1953_v57 = vsel %vm1917_vm1, %v3684_v11, %v4287_v61  ;;  %v1932_v54 = vsel %vm1917_vm1, %v4783_v59, %v4417_v26  ;;  %s4702_s23 = scalar_lea.hbm %s4760_s4, %s2997_s13 }
 0x144   : > { %v1873_v63 = vpop.permute.xlu1 %1872  ;;  %1862 = vrot.lane.b32.xlu0 %v3530_v0, %s3206_s29  ;;  %v2120_v0 = vsel %vm2098_vm7, %v2087_v41, %v1836_v9  ;;  %v1990_v53 = vsel %vm1966_vm2, %v1953_v57, %v4309_v39 }
 0x145   : > { %v2153_v30 = vsel %vm2131_vm8, %v2120_v0, %v1871_v29  ;;  %v2023_v2 = vsel %vm1999_vm3, %v1990_v53, %v4325_v42  ;;  %v2819_v42 = vrot.slane %v4365_v52, 9  ;;  %v1498_v52 = vsel %vm3350_vm4, %v1496_v27, %v1497_v14 }
 0x146   : > { %1843 = vrot.lane.b32.xlu1 %v4345_v25, %s3205_s14  ;;  %v1892_v17 = vpop.permute.xlu0 %1891  ;;  %v2056_v61 = vsel %vm2032_vm5, %v2023_v2, %v4339_v21 }
 0x147   : > { %v2172_v28 = vsel %vm2164_vm10, %v2139_v40, %v1892_v17  ;;  %v2089_v39 = vsel %vm2065_vm6, %v2056_v61, %v4357_v43 }
 0x148   : > { %v1906_v35 = vpop.permute.xlu1 %1905  ;;  %1864 = vrot.lane.b32.xlu0 %v3564_v22, %s3206_s29  ;;  %3028 = vmatmul.mubr.msk.bf16.gmra.mrb[4].mxu0 %vm2217_vm11, %v2172_v28  ;;  %v1488_v22 = vsel %vm3364_vm9, %v1483_v19, %v1487_v18  ;;  %v2122_v16 = vsel %vm2098_vm7, %v2089_v39, %v4391_v47 }
 0x149   : > { %v2186_v25 = vsel %vm2164_vm10, %v2153_v30, %v1906_v35  ;;  %v2872_v38 = vcombine.low %v1478_v10, %v1488_v22  ;;  %v4785_v30 = vld [vmem:[#allocation7_spill] sm:$0xff] }
 0x14a   : > { %1845 = vrot.lane.b32.xlu1 %v2871_v46, %s3205_s14  ;;  %3043 = vmatprep.mubr.msk.bf16.mxu1 %vm2217_vm11, %v2186_v25  ;;  %v1606_v9 = vpop.permute.xlu0 %1605  ;;  %v4784_v46 = vld [vmem:[#allocation8_spill] sm:$0xff]  ;;  %s2700_s14 = sshll.u32 %s3293_s8, 4  ;;  %s4706_s14 = int_to_ptr.vmem [resolvable:$true] %s2700_s14 }
 0x14b   : > { %v1935_v3 = vsel %vm1917_vm1, %v4784_v46, %v1606_v9  ;;  %s3135_s28 = scalar_lea.vmem %s4706_s14, 2048 }
 0x14c   : > { %v1620_v11 = vpop.permute.xlu1 %1619  ;;  %1897 = vrot.lane.b32.xlu0 %v3512_v51, %s3207_s30  ;;  %v2155_v51 = vsel %vm2131_vm8, %v2122_v16, %v1873_v63  ;;  %p3136_p12 = scmp.ne.s32.totalorder %s4706_s14, %s3135_s28 }
 0x14d   : > { %v1956_v35 = vsel %vm1917_vm1, %v4785_v30, %v1620_v11 }
 0x14e   : > { %1878 = vrot.lane.b32.xlu1 %v4363_v32, %s3206_s29  ;;  %v1684_v31 = vpop.permute.xlu0 %1683  ;;  %v1495_v32 = vsel %vm3350_vm4, %v2819_v42, %v1494_v50  ;;  %vm2653_vm4 = vcmask 519168   ;;  %p3137_p13 = pnand %p3136_p12, %p3273_p5 }
 0x14f   : > { %v2873_v8 = vcombine.low %v1495_v32, %v1498_v52  ;;  %v1976_v1 = vsel %vm1966_vm2, %v1932_v54, %v1684_v31 }
 0x150   : > { %v1908_v5 = vpop.permute.xlu1 %1907  ;;  %1899 = vrot.lane.b32.xlu0 %v3521_v56, %s3207_s30  ;;  %p3138_p0 = pneg %p3137_p13 }
 0x151   : > { %v2188_v21 = vsel %vm2164_vm10, %v2155_v51, %v1908_v5  ;;  %v4786_v51 = vld [vmem:[#allocation9_spill] sm:$0xff] }
 0x152   : > { %1880 = vrot.lane.b32.xlu1 %v2872_v38, %s3206_s29  ;;  %3044 = vmatmul.mubr.msk.bf16.gmra.mrb[4].mxu1 %vm2217_vm11, %v2188_v21  ;;  %v1686_v43 = vpop.permute.xlu0 %1685  ;;  %s3208_s29 = smov [#allocation3]  }
 0x153   : > { %v1978_v18 = vsel %vm1966_vm2, %v1935_v3, %v1686_v43 }
 0x154   : > { %v1622_v47 = vpop.permute.xlu1 %1621 }
 0x155   : > { %v1959_v5 = vsel %vm1917_vm1, %v4786_v51, %v1622_v47 }
 0x156   : > { %1913 = vrot.lane.b32.xlu1 %v4402_v49, %s3207_s30  ;;  %v1719_v37 = vpop.permute.xlu0 %1718 }
 0x157   : > { %v2009_v63 = vsel %vm1999_vm3, %v1976_v1, %v1719_v37 }
 0x158   : > { %v1700_v56 = vpop.permute.xlu1 %1699 }
 0x159   : > { %v1992_v53 = vsel %vm1966_vm2, %v1956_v35, %v1700_v56 }
 0x15a   : > { %1915 = vrot.lane.b32.xlu1 %v2873_v8, %s3207_s30  ;;  %v1721_v60 = vpop.permute.xlu0 %1720  ;;  %s3139_s30 = sshll.u32 %s3208_s29, 4  ;;  %s3140_s30 = int_to_ptr.vmem [resolvable:$false] %s3139_s30 }
 0x15b   : > { %v2011_v25 = vsel %vm1999_vm3, %v1978_v18, %v1721_v60  ;;  %s3141_s5 = scalar_lea.vmem %s3140_s30, 4096  ;;  %p3142_p1 = scmp.lt.s32.totalorder %s4706_s14, %s3140_s30 }
 0x15c   : > { %v1702_v36 = vpop.permute.xlu1 %1701  ;;  %p3143_p2 = scmp.lt.s32.totalorder %s3141_s5, %s3135_s28 }
 0x15d   : > { %v1994_v43 = vsel %vm1966_vm2, %v1959_v5, %v1702_v36 }
 0x15e   : > { %v1754_v7 = vpop.permute.xlu0 %1753  ;;  %p3144_p3 = por %p3143_p2, %p3142_p1 }
 0x15f   : > { %v2042_v13 = vsel %vm2032_vm5, %v2009_v63, %v1754_v7 }
 0x160   : > { %v1735_v62 = vpop.permute.xlu1 %1734  ;;  %p3145_p4 = pnand %p3144_p3, %p3138_p0 }
 0x161   : > { %v2025_v10 = vsel %vm1999_vm3, %v1992_v53, %v1735_v62 }
 0x162   : > { %v1756_v48 = vpop.permute.xlu0 %1755 }
 0x163   : > { %v2044_v9 = vsel %vm2032_vm5, %v2011_v25, %v1756_v48 }
 0x164   : > { %v1737_v29 = vpop.permute.xlu1 %1736 }
 0x165   : > { %v2027_v32 = vsel %vm1999_vm3, %v1994_v43, %v1737_v29 }
 0x166   : > { %v1789_v20 = vpop.permute.xlu0 %1788 }
 0x167   : > { %v2075_v41 = vsel %vm2065_vm6, %v2042_v13, %v1789_v20 }
 0x168   : > { %v1770_v45 = vpop.permute.xlu1 %1769 }
 0x169   : > { %v2058_v2 = vsel %vm2032_vm5, %v2025_v10, %v1770_v45 }
 0x16a   : > { %v1791_v33 = vpop.permute.xlu0 %1790 }
 0x16b   : > { %v2077_v22 = vsel %vm2065_vm6, %v2044_v9, %v1791_v33 }
 0x16c   : > { %v1772_v6 = vpop.permute.xlu1 %1771 }
 0x16d   : > { %v2060_v37 = vsel %vm2032_vm5, %v2027_v32, %v1772_v6 }
 0x16e   : > { %v1824_v55 = vpop.permute.xlu0 %1823 }
 0x16f   : > { %v2108_v17 = vsel %vm2098_vm7, %v2075_v41, %v1824_v55  ;;  %v4787_v41 = vld [vmem:[#allocation10_spill] sm:$0xff] }
 0x170   : > { %v1805_v23 = vpop.permute.xlu1 %1804 }
 0x171   : > { %v2091_v39 = vsel %vm2065_vm6, %v2058_v2, %v1805_v23 }
 0x172   : > { %v1826_v44 = vpop.permute.xlu0 %1825 }
 0x173   : > { %v2110_v61 = vsel %vm2098_vm7, %v2077_v22, %v1826_v44 }
 0x174   : > { %v1807_v12 = vpop.permute.xlu1 %1806 }
 0x175   : > { %v2093_v8 = vsel %vm2065_vm6, %v2060_v37, %v1807_v12 }
 0x176   : > { %v1859_v49 = vpop.permute.xlu0 %1858 }
 0x177   : > { %v2141_v0 = vsel %vm2131_vm8, %v2108_v17, %v1859_v49 }
 0x178   : > { %v1840_v24 = vpop.permute.xlu1 %1839 }
 0x179   : > { %v2124_v38 = vsel %vm2098_vm7, %v2091_v39, %v1840_v24 }
 0x17a   : > { %v1861_v34 = vpop.permute.xlu0 %1860 }
 0x17b   : > { %v2143_v11 = vsel %vm2131_vm8, %v2110_v61, %v1861_v34 }
 0x17c   : > { %v1842_v40 = vpop.permute.xlu1 %1841 }
 0x17d   : > { %v2126_v60 = vsel %vm2098_vm7, %v2093_v8, %v1842_v40 }
 0x17e   : > { %v1894_v28 = vpop.permute.xlu0 %1893 }
 0x17f   : > { %v2174_v26 = vsel %vm2164_vm10, %v2141_v0, %v1894_v28 }
 0x180   : > { %v1875_v19 = vpop.permute.xlu1 %1874  ;;  %3031 = vmatprep.mubr.msk.bf16.mxu0 %vm2217_vm11, %v2174_v26 }
 0x181   : > { %v2157_v42 = vsel %vm2131_vm8, %v2124_v38, %v1875_v19 }
 0x182   : > { %v1608_v57 = vpop.permute.xlu0 %1607 }
 0x183   : > { %v1938_v40 = vsel %vm1917_vm1, %v4787_v41, %v1608_v57 }
 0x184   : > { %v1877_v50 = vpop.permute.xlu1 %1876 }
 0x185   : > { %v2159_v7 = vsel %vm2131_vm8, %v2126_v60, %v1877_v50 }
 0x186   : > { %v1896_v31 = vpop.permute.xlu0 %1895 }
 0x187   : > { %v2176_v16 = vsel %vm2164_vm10, %v2143_v11, %v1896_v31 }
 0x188   : > { %v1910_v27 = vpop.permute.xlu1 %1909  ;;  %3032 = vmatmul.mubr.msk.bf16.gmra.mrb[8].mxu0 %vm2217_vm11, %v2176_v16 }
 0x189   : > { %v2190_v14 = vsel %vm2164_vm10, %v2157_v42, %v1910_v27 }
 0x18a   : > { %3047 = vmatprep.mubr.msk.bf16.mxu1 %vm2217_vm11, %v2190_v14  ;;  %v1610_v21 = vpop.permute.xlu0 %1609 }
 0x18b   : > { %v1941_v3 = vsel %vm1917_vm1, %v4169_v15, %v1610_v21 }
 0x18c   : > { %v1624_v52 = vpop.permute.xlu1 %1623 }
 0x18d   : > { %v1962_v2 = vsel %vm1917_vm1, %v4087_v58, %v1624_v52 }
 0x18e   : > { %v1688_v56 = vpop.permute.xlu0 %1687 }
 0x18f   : > { %v1980_v46 = vsel %vm1966_vm2, %v1938_v40, %v1688_v56 }
 0x190   : > { %v1912_v62 = vpop.permute.xlu1 %1911 }
 0x191   : > { %v2192_v47 = vsel %vm2164_vm10, %v2159_v7, %v1912_v62  ;;  %v4568_v7 = vld [vmem:[%s4758_s2] ss:$0 sm:$0xff] }
 0x192   : > { %3048 = vmatmul.mubr.msk.bf16.gmra.mrb[8].mxu1 %vm2217_vm11, %v2192_v47  ;;  %v1690_v48 = vpop.permute.xlu0 %1689  ;;  %v4573_v47 = vld [vmem:[%s4759_s3] ss:$0 sm:$0xff] }
 0x193   : > { %v1982_v30 = vsel %vm1966_vm2, %v1941_v3, %v1690_v48 }
 0x194   : > { %v1626_v20 = vpop.permute.xlu1 %1625 }
 0x195   : > { %v1965_v27 = vsel %vm1917_vm1, %v4219_v4, %v1626_v20 }
 0x196   : > { %v1723_v36 = vpop.permute.xlu0 %1722 }
 0x197   : > { %v2013_v0 = vsel %vm1999_vm3, %v1980_v46, %v1723_v36 }
 0x198   : > { %v1704_v45 = vpop.permute.xlu1 %1703 }
 0x199   : > { %v1996_v11 = vsel %vm1966_vm2, %v1962_v2, %v1704_v45 }
 0x19a   : > { %v1725_v29 = vpop.permute.xlu0 %1724 }
 0x19b   : > { %v2015_v25 = vsel %vm1999_vm3, %v1982_v30, %v1725_v29 }
 0x19c   : > { %v1706_v33 = vpop.permute.xlu1 %1705 }
 0x19d   : > { %v1998_v58 = vsel %vm1966_vm2, %v1965_v27, %v1706_v33 }
 0x19e   : > { %v1758_v55 = vpop.permute.xlu0 %1757 }
 0x19f   : > { %v2046_v26 = vsel %vm2032_vm5, %v2013_v0, %v1758_v55 }
 0x1a0   : > { %v1739_v6 = vpop.permute.xlu1 %1738 }
 0x1a1   : > { %v2029_v38 = vsel %vm1999_vm3, %v1996_v11, %v1739_v6 }
 0x1a2   : > { %v1760_v23 = vpop.permute.xlu0 %1759 }
 0x1a3   : > { %v2048_v9 = vsel %vm2032_vm5, %v2015_v25, %v1760_v23 }
 0x1a4   : > { %v1741_v44 = vpop.permute.xlu1 %1740 }
 0x1a5   : > { %v2031_v5 = vsel %vm1999_vm3, %v1998_v58, %v1741_v44 }
 0x1a6   : > { %v1793_v12 = vpop.permute.xlu0 %1792 }
 0x1a7   : > { %v2079_v19 = vsel %vm2065_vm6, %v2046_v26, %v1793_v12 }
 0x1a8   : > { %v1774_v49 = vpop.permute.xlu1 %1773 }
 0x1a9   : > { %v2062_v42 = vsel %vm2032_vm5, %v2029_v38, %v1774_v49 }
 0x1aa   : > { %v1795_v59 = vpop.permute.xlu0 %1794 }
 0x1ab   : > { %v2081_v10 = vsel %vm2065_vm6, %v2048_v9, %v1795_v59 }
 0x1ac   : > { %v1776_v54 = vpop.permute.xlu1 %1775 }
 0x1ad   : > { %v2064_v32 = vsel %vm2032_vm5, %v2031_v5, %v1776_v54 }
 0x1ae   : > { %v1828_v24 = vpop.permute.xlu0 %1827 }
 0x1af   : > { %v2112_v35 = vsel %vm2098_vm7, %v2079_v19, %v1828_v24 }
 0x1b0   : > { %v1809_v1 = vpop.permute.xlu1 %1808 }
 0x1b1   : > { %v2095_v14 = vsel %vm2065_vm6, %v2062_v42, %v1809_v1 }
 0x1b2   : > { %v1830_v63 = vpop.permute.xlu0 %1829 }
 0x1b3   : > { %v2114_v50 = vsel %vm2098_vm7, %v2081_v10, %v1830_v63 }
 0x1b4   : > { %v1811_v34 = vpop.permute.xlu1 %1810 }
 0x1b5   : > { %v2097_v37 = vsel %vm2065_vm6, %v2064_v32, %v1811_v34 }
 0x1b6   : > { %v1863_v13 = vpop.permute.xlu0 %1862 }
 0x1b7   : > { %v2145_v57 = vsel %vm2131_vm8, %v2112_v35, %v1863_v13 }
 0x1b8   : > { %v1844_v17 = vpop.permute.xlu1 %1843 }
 0x1b9   : > { %v2128_v51 = vsel %vm2098_vm7, %v2095_v14, %v1844_v17 }
 0x1ba   : > { %v1865_v28 = vpop.permute.xlu0 %1864 }
 0x1bb   : > { %v2147_v61 = vsel %vm2131_vm8, %v2114_v50, %v1865_v28 }
 0x1bc   : > { %v1846_v18 = vpop.permute.xlu1 %1845 }
 0x1bd   : > { %v2130_v4 = vsel %vm2098_vm7, %v2097_v37, %v1846_v18 }
 0x1be   : > { %v1898_v53 = vpop.permute.xlu0 %1897 }
 0x1bf   : > { %v2178_v15 = vsel %vm2164_vm10, %v2145_v57, %v1898_v53 }
 0x1c0   : > { %v1879_v22 = vpop.permute.xlu1 %1878  ;;  %3035 = vmatprep.mubr.msk.bf16.mxu0 %vm2217_vm11, %v2178_v15 }
 0x1c1   : > { %v2161_v21 = vsel %vm2131_vm8, %v2128_v51, %v1879_v22 }
 0x1c2   : > { %v1900_v39 = vpop.permute.xlu0 %1899 }
 0x1c3   : > { %v2180_v31 = vsel %vm2164_vm10, %v2147_v61, %v1900_v39 }
 0x1c4   : > { %v1881_v16 = vpop.permute.xlu1 %1880  ;;  %3036 = vmatmul.mubr.msk.bf16.gmra.mrb[12].mxu0 %vm2217_vm11, %v2180_v31 }
 0x1c5   : > { %v2163_v8 = vsel %vm2131_vm8, %v2130_v4, %v1881_v16 }
 0x1c8   : > { %v1914_v43 = vpop.permute.xlu1 %1913 }
 0x1c9   : > { %v2194_v52 = vsel %vm2164_vm10, %v2161_v21, %v1914_v43 }
 0x1ca   : > { %3051 = vmatprep.mubr.msk.bf16.mxu1 %vm2217_vm11, %v2194_v52 }
 0x1cc   : > { %v1916_v56 = vpop.permute.xlu1 %1915 }
 0x1cd   : > { %v2196_v60 = vsel %vm2164_vm10, %v2163_v8, %v1916_v56 }
 0x1ce   : > { %3052 = vmatmul.mubr.msk.bf16.gmra.mrb[12].mxu1 %vm2217_vm11, %v2196_v60 }
 0x1db   : > { %v3025_v62 = vpop.f32.mrb[0].mxu0 }
 0x1dc   : > { %v2424_v48 = vmul.f32 %v3025_v62, %v4568_v7  ;;  %v2288_v20 = vpop.f32.mrb[1].mxu0 }
 0x1dd   : > { %v2422_v36 = vmul.f32 %v4568_v7, %v2288_v20  ;;  %v3026_v45 = vpop.f32.mrb[2].mxu0 }
 0x1de   : > { %v2463_v29 = vadd.f32 %v4573_v47, %v2424_v48  ;;  %v2425_v33 = vmul.f32 %v3026_v45, %v4568_v7  ;;  %v2291_v55 = vpop.f32.mrb[3].mxu0 }
 0x1df   : > { %v2461_v6 = vadd.f32 %v4573_v47, %v2422_v36  ;;  %v2423_v23 = vmul.f32 %v4568_v7, %v2291_v55 }
 0x1e0   : > { %v2495_v44 = vmax.f32 %v2463_v29, 0.0  ;;  %v2464_v12 = vadd.f32 %v4573_v47, %v2425_v33 }
 0x1e1   : > { %v2493_v49 = vmax.f32 %v2461_v6, 0.0  ;;  %v2462_v59 = vadd.f32 %v4573_v47, %v2423_v23 }
 0x1e2   : > { %v2967_v54 = vpack.c.bf16 %v2495_v44, %v2495_v44  ;;  %v2496_v24 = vmax.f32 %v2464_v12, 0.0 }
 0x1e3   : > { %v2965_v1 = vpack.c.bf16 %v2493_v49, %v2493_v49  ;;  %v2494_v63 = vmax.f32 %v2462_v59, 0.0 }
 0x1e4   : > { %2656 = vst.msk [vmem:[%s3293_s8 + $0x8] sm:$0xf] %vm2653_vm4, %v2967_v54  ;;  %v2968_v34 = vpack.c.bf16 %v2496_v24, %v2496_v24 }
 0x1e5   : > { %2654 = vst.msk [vmem:[%s3293_s8] sm:$0xf] %vm2653_vm4, %v2965_v1  ;;  %v2966_v13 = vpack.c.bf16 %v2494_v63, %v2494_v63  ;;  %v3041_v41 = vpop.f32.mrb[0].mxu1 }
 0x1e6   : > { %2657 = vst.msk [vmem:[%s3293_s8 + $0xc] sm:$0xf] %vm2653_vm4, %v2968_v34  ;;  %v2440_v40 = vmul.f32 %v3041_v41, %v4568_v7  ;;  %v2352_v17 = vpop.f32.mrb[1].mxu1 }
 0x1e7   : > { %2655 = vst.msk [vmem:[%s3293_s8 + $0x4] sm:$0xf] %vm2653_vm4, %v2966_v13  ;;  %v2438_v46 = vmul.f32 %v4568_v7, %v2352_v17  ;;  %v3042_v3 = vpop.f32.mrb[2].mxu1 }
 0x1e8   : > { %v2479_v0 = vadd.f32 %v4573_v47, %v2440_v40  ;;  %v2441_v28 = vmul.f32 %v3042_v3, %v4568_v7  ;;  %v2355_v26 = vpop.f32.mrb[3].mxu1 }
 0x1e9   : > { %v2477_v19 = vadd.f32 %v4573_v47, %v2438_v46  ;;  %v2439_v18 = vmul.f32 %v4568_v7, %v2355_v26 }
 0x1ea   : > { %v2511_v30 = vmax.f32 %v2479_v0, 0.0  ;;  %v2480_v35 = vadd.f32 %v4573_v47, %v2441_v28 }
 0x1eb   : > { %v2509_v25 = vmax.f32 %v2477_v19, 0.0  ;;  %v2478_v57 = vadd.f32 %v4573_v47, %v2439_v18 }
 0x1ec   : > { %v2983_v53 = vpack.c.bf16 %v2511_v30, %v2511_v30  ;;  %v2512_v9 = vmax.f32 %v2480_v35, 0.0 }
 0x1ed   : > { %v2981_v15 = vpack.c.bf16 %v2509_v25, %v2509_v25  ;;  %v2510_v10 = vmax.f32 %v2478_v57, 0.0 }
 0x1ee   : > { %2672 = vst.msk [vmem:[%s3293_s8 + $0x48] sm:$0xf] %vm2653_vm4, %v2983_v53  ;;  %v2984_v22 = vpack.c.bf16 %v2512_v9, %v2512_v9 }
 0x1ef   : > { %2670 = vst.msk [vmem:[%s3293_s8 + $0x40] sm:$0xf] %vm2653_vm4, %v2981_v15  ;;  %v2982_v50 = vpack.c.bf16 %v2510_v10, %v2510_v10 }
 0x1f0   : > { %2673 = vst.msk [vmem:[%s3293_s8 + $0x4c] sm:$0xf] %vm2653_vm4, %v2984_v22 }
 0x1f1   : > { %2671 = vst.msk [vmem:[%s3293_s8 + $0x44] sm:$0xf] %vm2653_vm4, %v2982_v50 }
 0x21b   : > { %v3029_v2 = vpop.f32.mrb[4].mxu0 }
 0x21c   : > { %v2428_v61 = vmul.f32 %v3029_v2, %v4568_v7  ;;  %v2304_v39 = vpop.f32.mrb[5].mxu0 }
 0x21d   : > { %v2426_v11 = vmul.f32 %v4568_v7, %v2304_v39  ;;  %v3030_v31 = vpop.f32.mrb[6].mxu0 }
 0x21e   : > { %v2467_v38 = vadd.f32 %v4573_v47, %v2428_v61  ;;  %v2429_v16 = vmul.f32 %v3030_v31, %v4568_v7  ;;  %v2307_v42 = vpop.f32.mrb[7].mxu0 }
 0x21f   : > { %v2465_v27 = vadd.f32 %v4573_v47, %v2426_v11  ;;  %v2427_v14 = vmul.f32 %v4568_v7, %v2307_v42 }
 0x220   : > { %v2499_v58 = vmax.f32 %v2467_v38, 0.0  ;;  %v2468_v51 = vadd.f32 %v4573_v47, %v2429_v16 }
 0x221   : > { %v2497_v5 = vmax.f32 %v2465_v27, 0.0  ;;  %v2466_v21 = vadd.f32 %v4573_v47, %v2427_v14 }
 0x222   : > { %v2971_v43 = vpack.c.bf16 %v2499_v58, %v2499_v58  ;;  %v2500_v32 = vmax.f32 %v2468_v51, 0.0 }
 0x223   : > { %v2969_v52 = vpack.c.bf16 %v2497_v5, %v2497_v5  ;;  %v2498_v37 = vmax.f32 %v2466_v21, 0.0 }
 0x224   : > { %2660 = vst.msk [vmem:[%s3293_s8 + $0x18] sm:$0xf] %vm2653_vm4, %v2971_v43  ;;  %v2972_v4 = vpack.c.bf16 %v2500_v32, %v2500_v32 }
 0x225   : > { %2658 = vst.msk [vmem:[%s3293_s8 + $0x10] sm:$0xf] %vm2653_vm4, %v2969_v52  ;;  %v2970_v8 = vpack.c.bf16 %v2498_v37, %v2498_v37  ;;  %v3045_v56 = vpop.f32.mrb[4].mxu1 }
 0x226   : > { %2661 = vst.msk [vmem:[%s3293_s8 + $0x1c] sm:$0xf] %vm2653_vm4, %v2972_v4  ;;  %v2444_v60 = vmul.f32 %v3045_v56, %v4568_v7  ;;  %v2368_v62 = vpop.f32.mrb[5].mxu1 }
 0x227   : > { %2659 = vst.msk [vmem:[%s3293_s8 + $0x14] sm:$0xf] %vm2653_vm4, %v2970_v8  ;;  %v2442_v48 = vmul.f32 %v4568_v7, %v2368_v62  ;;  %v3046_v20 = vpop.f32.mrb[6].mxu1 }
 0x228   : > { %v2483_v36 = vadd.f32 %v4573_v47, %v2444_v60  ;;  %v2445_v45 = vmul.f32 %v3046_v20, %v4568_v7  ;;  %v2371_v29 = vpop.f32.mrb[7].mxu1 }
 0x229   : > { %v2481_v33 = vadd.f32 %v4573_v47, %v2442_v48  ;;  %v2443_v55 = vmul.f32 %v4568_v7, %v2371_v29 }
 0x22a   : > { %v2515_v6 = vmax.f32 %v2483_v36, 0.0  ;;  %v2484_v23 = vadd.f32 %v4573_v47, %v2445_v45 }
 0x22b   : > { %v2513_v44 = vmax.f32 %v2481_v33, 0.0  ;;  %v2482_v12 = vadd.f32 %v4573_v47, %v2443_v55 }
 0x22c   : > { %v2987_v49 = vpack.c.bf16 %v2515_v6, %v2515_v6  ;;  %v2516_v59 = vmax.f32 %v2484_v23, 0.0 }
 0x22d   : > { %v2985_v54 = vpack.c.bf16 %v2513_v44, %v2513_v44  ;;  %v2514_v24 = vmax.f32 %v2482_v12, 0.0 }
 0x22e   : > { %2676 = vst.msk [vmem:[%s3293_s8 + $0x58] sm:$0xf] %vm2653_vm4, %v2987_v49  ;;  %v2988_v1 = vpack.c.bf16 %v2516_v59, %v2516_v59 }
 0x22f   : > { %2674 = vst.msk [vmem:[%s3293_s8 + $0x50] sm:$0xf] %vm2653_vm4, %v2985_v54  ;;  %v2986_v63 = vpack.c.bf16 %v2514_v24, %v2514_v24 }
 0x230   : > { %2677 = vst.msk [vmem:[%s3293_s8 + $0x5c] sm:$0xf] %vm2653_vm4, %v2988_v1 }
 0x231   : > { %2675 = vst.msk [vmem:[%s3293_s8 + $0x54] sm:$0xf] %vm2653_vm4, %v2986_v63 }
 0x25b   : > { %v3033_v34 = vpop.f32.mrb[8].mxu0 }
 0x25c   : > { %v2432_v13 = vmul.f32 %v3033_v34, %v4568_v7  ;;  %v2320_v41 = vpop.f32.mrb[9].mxu0 }
 0x25d   : > { %v2430_v40 = vmul.f32 %v4568_v7, %v2320_v41  ;;  %v3034_v17 = vpop.f32.mrb[10].mxu0 }
 0x25e   : > { %v2471_v46 = vadd.f32 %v4573_v47, %v2432_v13  ;;  %v2433_v3 = vmul.f32 %v3034_v17, %v4568_v7  ;;  %v2323_v0 = vpop.f32.mrb[11].mxu0 }
 0x25f   : > { %v2469_v28 = vadd.f32 %v4573_v47, %v2430_v40  ;;  %v2431_v26 = vmul.f32 %v4568_v7, %v2323_v0 }
 0x260   : > { %v2503_v19 = vmax.f32 %v2471_v46, 0.0  ;;  %v2472_v18 = vadd.f32 %v4573_v47, %v2433_v3 }
 0x261   : > { %v2501_v30 = vmax.f32 %v2469_v28, 0.0  ;;  %v2470_v35 = vadd.f32 %v4573_v47, %v2431_v26 }
 0x262   : > { %v2975_v25 = vpack.c.bf16 %v2503_v19, %v2503_v19  ;;  %v2504_v57 = vmax.f32 %v2472_v18, 0.0 }
 0x263   : > { %v2973_v53 = vpack.c.bf16 %v2501_v30, %v2501_v30  ;;  %v2502_v9 = vmax.f32 %v2470_v35, 0.0 }
 0x264   : > { %2664 = vst.msk [vmem:[%s3293_s8 + $0x28] sm:$0xf] %vm2653_vm4, %v2975_v25  ;;  %v2976_v15 = vpack.c.bf16 %v2504_v57, %v2504_v57 }
 0x265   : > { %2662 = vst.msk [vmem:[%s3293_s8 + $0x20] sm:$0xf] %vm2653_vm4, %v2973_v53  ;;  %v2974_v10 = vpack.c.bf16 %v2502_v9, %v2502_v9  ;;  %v3049_v22 = vpop.f32.mrb[8].mxu1 }
 0x266   : > { %2665 = vst.msk [vmem:[%s3293_s8 + $0x2c] sm:$0xf] %vm2653_vm4, %v2976_v15  ;;  %v2448_v50 = vmul.f32 %v3049_v22, %v4568_v7  ;;  %v2384_v2 = vpop.f32.mrb[9].mxu1 }
 0x267   : > { %2663 = vst.msk [vmem:[%s3293_s8 + $0x24] sm:$0xf] %vm2653_vm4, %v2974_v10  ;;  %v2446_v61 = vmul.f32 %v4568_v7, %v2384_v2  ;;  %v3050_v39 = vpop.f32.mrb[10].mxu1 }
 0x268   : > { %v2487_v11 = vadd.f32 %v4573_v47, %v2448_v50  ;;  %v2449_v31 = vmul.f32 %v3050_v39, %v4568_v7  ;;  %v2387_v38 = vpop.f32.mrb[11].mxu1 }
 0x269   : > { %v2485_v16 = vadd.f32 %v4573_v47, %v2446_v61  ;;  %v2447_v42 = vmul.f32 %v4568_v7, %v2387_v38 }
 0x26a   : > { %v2519_v27 = vmax.f32 %v2487_v11, 0.0  ;;  %v2488_v14 = vadd.f32 %v4573_v47, %v2449_v31 }
 0x26b   : > { %v2517_v58 = vmax.f32 %v2485_v16, 0.0  ;;  %v2486_v51 = vadd.f32 %v4573_v47, %v2447_v42 }
 0x26c   : > { %v2991_v5 = vpack.c.bf16 %v2519_v27, %v2519_v27  ;;  %v2520_v21 = vmax.f32 %v2488_v14, 0.0 }
 0x26d   : > { %v2989_v43 = vpack.c.bf16 %v2517_v58, %v2517_v58  ;;  %v2518_v32 = vmax.f32 %v2486_v51, 0.0 }
 0x26e   : > { %2680 = vst.msk [vmem:[%s3293_s8 + $0x68] sm:$0xf] %vm2653_vm4, %v2991_v5  ;;  %v2992_v52 = vpack.c.bf16 %v2520_v21, %v2520_v21 }
 0x26f   : > { %2678 = vst.msk [vmem:[%s3293_s8 + $0x60] sm:$0xf] %vm2653_vm4, %v2989_v43  ;;  %v2990_v37 = vpack.c.bf16 %v2518_v32, %v2518_v32 }
 0x270   : > { %2681 = vst.msk [vmem:[%s3293_s8 + $0x6c] sm:$0xf] %vm2653_vm4, %v2992_v52 }
 0x271   : > { %2679 = vst.msk [vmem:[%s3293_s8 + $0x64] sm:$0xf] %vm2653_vm4, %v2990_v37 }
 0x297   : > { %v3037_v4 = vpop.f32.mrb[12].mxu0 }
 0x298   : > { %v2436_v8 = vmul.f32 %v3037_v4, %v4568_v7  ;;  %v2336_v56 = vpop.f32.mrb[13].mxu0 }
 0x299   : > { %v2434_v60 = vmul.f32 %v4568_v7, %v2336_v56  ;;  %v3038_v62 = vpop.f32.mrb[14].mxu0 }
 0x29a   : > { %v2475_v48 = vadd.f32 %v4573_v47, %v2436_v8  ;;  %v2437_v20 = vmul.f32 %v3038_v62, %v4568_v7  ;;  %v2339_v36 = vpop.f32.mrb[15].mxu0 }
 0x29b   : > { %v2473_v45 = vadd.f32 %v4573_v47, %v2434_v60  ;;  %v2435_v29 = vmul.f32 %v4568_v7, %v2339_v36 }
 0x29c   : > { %v2507_v33 = vmax.f32 %v2475_v48, 0.0  ;;  %v2476_v55 = vadd.f32 %v4573_v47, %v2437_v20 }
 0x29d   : > { %v2505_v6 = vmax.f32 %v2473_v45, 0.0  ;;  %v2474_v23 = vadd.f32 %v4573_v47, %v2435_v29 }
 0x29e   : > { %v2979_v44 = vpack.c.bf16 %v2507_v33, %v2507_v33  ;;  %v2508_v12 = vmax.f32 %v2476_v55, 0.0 }
 0x29f   : > { %v2977_v49 = vpack.c.bf16 %v2505_v6, %v2505_v6  ;;  %v2506_v59 = vmax.f32 %v2474_v23, 0.0 }
 0x2a0   : > { %2668 = vst.msk [vmem:[%s3293_s8 + $0x38] sm:$0xf] %vm2653_vm4, %v2979_v44  ;;  %v2980_v54 = vpack.c.bf16 %v2508_v12, %v2508_v12 }
 0x2a1   : > { %2666 = vst.msk [vmem:[%s3293_s8 + $0x30] sm:$0xf] %vm2653_vm4, %v2977_v49  ;;  %v2978_v24 = vpack.c.bf16 %v2506_v59, %v2506_v59  ;;  %v3053_v1 = vpop.f32.mrb[12].mxu1 }
 0x2a2   : > { %2669 = vst.msk [vmem:[%s3293_s8 + $0x3c] sm:$0xf] %vm2653_vm4, %v2980_v54  ;;  %v2452_v63 = vmul.f32 %v3053_v1, %v4568_v7  ;;  %v2400_v34 = vpop.f32.mrb[13].mxu1 }
 0x2a3   : > { %2667 = vst.msk [vmem:[%s3293_s8 + $0x34] sm:$0xf] %vm2653_vm4, %v2978_v24  ;;  %v2450_v13 = vmul.f32 %v4568_v7, %v2400_v34  ;;  %v3054_v41 = vpop.f32.mrb[14].mxu1 }
 0x2a4   : > { %v2491_v40 = vadd.f32 %v4573_v47, %v2452_v63  ;;  %v2453_v17 = vmul.f32 %v3054_v41, %v4568_v7  ;;  %v2403_v46 = vpop.f32.mrb[15].mxu1 }
 0x2a5   : > { %v2489_v3 = vadd.f32 %v4573_v47, %v2450_v13  ;;  %v2451_v0 = vmul.f32 %v4568_v7, %v2403_v46 }
 0x2a6   : > { %v2523_v28 = vmax.f32 %v2491_v40, 0.0  ;;  %v2492_v26 = vadd.f32 %v4573_v47, %v2453_v17 }
 0x2a7   : > { %v2521_v19 = vmax.f32 %v2489_v3, 0.0  ;;  %v2490_v18 = vadd.f32 %v4573_v47, %v2451_v0 }
 0x2a8   : > { %v2995_v30 = vpack.c.bf16 %v2523_v28, %v2523_v28  ;;  %v2524_v35 = vmax.f32 %v2492_v26, 0.0 }
 0x2a9   : > { %v2993_v25 = vpack.c.bf16 %v2521_v19, %v2521_v19  ;;  %v2522_v57 = vmax.f32 %v2490_v18, 0.0 }
 0x2aa   : > { %2684 = vst.msk [vmem:[%s3293_s8 + $0x78] sm:$0xf] %vm2653_vm4, %v2995_v30  ;;  %v2996_v53 = vpack.c.bf16 %v2524_v35, %v2524_v35 }
 0x2ab   : > { %2682 = vst.msk [vmem:[%s3293_s8 + $0x70] sm:$0xf] %vm2653_vm4, %v2993_v25  ;;  %v2994_v7 = vpack.c.bf16 %v2522_v57, %v2522_v57 }
 0x2ac   : > { %2685 = vst.msk [vmem:[%s3293_s8 + $0x7c] sm:$0xf] %vm2653_vm4, %v2996_v53 }
 0x2ad   : > { %2683 = vst.msk [vmem:[%s3293_s8 + $0x74] sm:$0xf] %vm2653_vm4, %v2994_v7 }
 0x2ae   : > { %3148 = shalt.err (!%p3145_p4)
}
 0x2af   : > { %s3149_s27 = scalar_lea.hbm %s4702_s23, 2048  ;;  %s3153_s7 = scalar_lea.hbm %s4760_s4, 4096 }
 0x2b0   : > { %p3150_p7 = scmp.ne.s32.totalorder %s4702_s23, %s3149_s27  ;;  %p3154_p10 = scmp.lt.u32.totalorder %s4702_s23, %s4760_s4 }
 0x2b1   : > { %p3155_p11 = scmp.lt.u32.totalorder %s3153_s7, %s3149_s27  ;;  %p3157_p13 = scmp.lt.u32.totalorder %s3149_s27, %s4702_s23 }
 0x2b2   : > { %p3151_p8 = pnand %p3150_p7, %p3273_p5 }
 0x2b3   : > { %p3156_p12 = por %p3155_p11, %p3154_p10 }
 0x2b4   : > { %p3152_p9 = pneg %p3151_p8 }
 0x2b5   : > { %p3158_p0 = por %p3157_p13, %p3156_p12 }
 0x2b7   : > { %p3159_p1 = pnand %p3158_p0, %p3152_p9 }
 0x2b9   : > { %3162 = shalt.err (!%p3159_p1)
}
 0x2ba   : > { %s3209_s12 = smov 64  }
 0x2bb   : > { %3063 = dma.vmem_to_hbm [thread:$0]  (%p3273_p5), %s4706_s14, 2048, %s4702_s23, %s4714_s19, %s3209_s12, %s3209_s12, %s3201_s10  }
 0x2bc PF: > { %p3069_p2 = scmp.ge.s32.totalorder %s3197_s18, 2  ;;  %s2715_s13 = sand.u32 1, %s3185_s15  }
 0x2bd   : > { %s2716_s20 = scalar_lea.sflag [#allocation4], %s2715_s13 }
 0x2be   : > { %p3066_p3 = pnand %p3069_p2, %p3277_p6 }
 0x2c0   : > { %3180 = dma.done.wait (!%p3066_p3), %s2716_s20, 2048  }
 0x2c1   : > { %3182 = vsyncadd (!%p3066_p3), %s2716_s20, 4294965248  ;;  %p14_p4 = scmp.ge.s32.totalorder %s3260_s21, 4   ;;  %s4788_s15 = smov %s3189_s16 }
 0x2c2   : > { %s4789_s16 = smov %s3193_s17  ;;  %s4790_s17 = smov %s3271_s24 }
 0x2c3   : > { %s4791_s18 = smov %s3260_s21  ;;  %16 = sbr.rel (!%p14_p4) target bundleno = 3 (0x3), region = 76 }
 0x2ca   :  { %2721 = vsyncpa [#allocation4], 1 }
 0x2cb   :  { %2723 = vsyncpa [#allocation4 + $0x1], 1 }

</bundles_post_ra>
